<compile_context>
chip_gen: v5e
topology: v5e:2x2
jax: 0.10.0
libtpu: 0.0.40
codegen_flags: <defaults>
</compile_context>

<pallas_src>
import functools
import math

import jax
import jax.numpy as jnp
from jax import lax
from jax.experimental import pallas as pl
from jax.experimental.pallas import tpu as pltpu

INIT_W = [1.0, 1.0, 5.0, -0.5, -0.5, 0.2, 1.4, -0.2, 0.8, 2.0, -0.2, 0.2, 1.0]

_LANES = 128                       # vreg lane width
_SEQ_CHUNK = 128                   # max seq steps resident per grid step
_LN_0P9 = math.log(0.9)


def _fsrs_kernel(flag_ref, w_ref, t_ref, x_ref, s0_s_ref, s0_d_ref,
                 out_s_ref, out_d_ref, fin_s_ref, fin_d_ref,
                 stab_sc, diff_sc, *, seq_len, unroll):
    """Sequential FSRSv3 recurrence over one seq chunk of one batch tile."""
    c = pl.program_id(1)                  # seq-chunk index ("arbitrary" axis)
    chunk = t_ref.shape[0]                # static steps per chunk

    # 13 scalar weights from SMEM (loaded once per grid step)
    w = [w_ref[k] for k in range(13)]

    # loop-invariant scalar precomputation (hoisted off the serial path)
    exp_w6 = jnp.exp(w[6])
    w5_w2 = w[5] * w[2]
    one_m_w5 = 1.0 - w[5]

    # whole-batch "fresh state" flag (torch.equal semantics, computed in wrapper)
    init_is_zero = flag_ref[0] != 0

    def existing_state_step(tl, rating, stab, diff):
        # tl = ln(0.9) * elapsed_time (pre-scaled in the wrapper)
        # r = 0.9 ** (t / stab) = exp(tl / stab); approx vrcp (1 EUP issue)
        # plus one Newton-Raphson step (VPU only) instead of a full divide.
        rcp = pl.reciprocal(stab, approx=True)
        rcp = rcp * (2.0 - stab * rcp)
        r = jnp.exp(tl * rcp)
        nd = diff + w[4] * (rating - 3.0)
        nd = jnp.clip(w5_w2 + one_m_w5 * nd, 1.0, 10.0)   # mean reversion to w2
        log_stab = jnp.log(stab)            # shared by stab**w7 and stab**w11
        log_nd = jnp.log(nd)
        one_m_r = 1.0 - r
        s_succ = stab * (1.0 + exp_w6 * (11.0 - nd) * jnp.exp(w[7] * log_stab)
                         * (jnp.exp(one_m_r * w[8]) - 1.0))
        # fused fail branch: w9 * nd**w10 * stab**w11 * exp((1-r)*w12)
        s_fail = w[9] * jnp.exp(w[10] * log_nd + w[11] * log_stab
                                + one_m_r * w[12])
        ns = jnp.where(rating > 1.0, s_succ, s_fail)
        ns = jnp.clip(ns, 0.1, 36500.0)
        return ns, nd

    # at the first seq chunk of each batch tile, seed the carry from the
    # initial state; later chunks continue from the persistent VMEM scratch.
    @pl.when(c == 0)
    def _():
        stab_sc[...] = s0_s_ref[...]
        diff_sc[...] = s0_d_ref[...]

    # ---- first step of this chunk (the fresh-state branch can only fire at the
    # very first step of the whole sequence; afterwards stab >= 0.1) ----
    t0 = t_ref[0]
    x0 = x_ref[0]
    ns0, nd0 = existing_state_step(t0, x0, stab_sc[...], diff_sc[...])
    is_fresh = jnp.logical_and(c == 0, init_is_zero)
    ns_fresh = jnp.clip(w[0] + w[1] * (x0 - 1.0), 0.1, 36500.0)
    nd_fresh = jnp.clip(w[2] + w[3] * (x0 - 3.0), 1.0, 10.0)
    stab = jnp.where(is_fresh, ns_fresh, ns0)
    diff = jnp.where(is_fresh, nd_fresh, nd0)
    out_s_ref[0] = stab
    out_d_ref[0] = diff

    # ---- remaining steps of the chunk ----
    def body(i, carry):
        stab_c, diff_c = carry
        ns, nd = existing_state_step(t_ref[i], x_ref[i], stab_c, diff_c)
        out_s_ref[i] = ns
        out_d_ref[i] = nd
        # padded seq tail (last chunk only): write garbage rows that the wrapper
        # slices away, but do NOT advance the carried state.
        valid = (c * chunk + i) < seq_len
        ns = jnp.where(valid, ns, stab_c)
        nd = jnp.where(valid, nd, diff_c)
        return ns, nd

    stab, diff = lax.fori_loop(1, chunk, body, (stab, diff), unroll=unroll)

    # persist the carry for the next seq chunk and expose the final state
    stab_sc[...] = stab
    diff_sc[...] = diff
    fin_s_ref[...] = stab
    fin_d_ref[...] = diff


def fsrs_v3_forward(w, inputs, state=None, interleave_outputs=True):
    """FSRSv3 forward.

    inputs: [seq_len, batch, 2]  ([..., 0] = elapsed time, [..., 1] = rating)
    state : [batch, 2] or None   (col 0 = stability, col 1 = difficulty)
    returns (outputs [seq_len, batch, 2], final_state [batch, 2]); with
    interleave_outputs=False, outputs is the pair of dense planes
    (stability [seq_len, batch], difficulty [seq_len, batch]).
    """
    inputs = jnp.asarray(inputs, jnp.float32)
    seq_len, batch, _ = inputs.shape
    if state is None:
        state = jnp.zeros((batch, 2), jnp.float32)
    state = jnp.asarray(state, jnp.float32)
    w = jnp.asarray(w, jnp.float32)

    # whole-batch fresh-state flag (matches torch.equal on the unpadded state)
    flag = (jnp.sum(jnp.abs(state)) == 0.0).astype(jnp.int32).reshape(1)

    # ---- batch tiling: 8 sublanes for tiny batches, 16 (2 vreg chains) beyond ----
    b_sub_need = -(-batch // _LANES)
    tile_sub = 8 if b_sub_need <= 8 else 16
    tile_b = tile_sub * _LANES
    padded_b = -(-batch // tile_b) * tile_b
    pad_b = padded_b - batch
    b_sub = padded_b // _LANES
    num_tiles = padded_b // tile_b

    # ---- seq chunking: keep per-block VMEM small and pipelining deep ----
    chunk = min(seq_len, _SEQ_CHUNK)
    num_chunks = -(-seq_len // chunk)
    padded_s = num_chunks * chunk
    pad_s = padded_s - seq_len

    # pre-scale elapsed time by ln(0.9) (fuses into the pad/reshape copy):
    # r = 0.9**(t/s) = exp((ln0.9 * t) / s)
    t = jnp.pad(inputs[:, :, 0] * jnp.float32(_LN_0P9), ((0, pad_s), (0, pad_b)))
    x = jnp.pad(inputs[:, :, 1], ((0, pad_s), (0, pad_b)), constant_values=1.0)
    s0_s = jnp.pad(state[:, 0], (0, pad_b), constant_values=1.0)
    s0_d = jnp.pad(state[:, 1], (0, pad_b), constant_values=1.0)

    t = t.reshape(padded_s, b_sub, _LANES)
    x = x.reshape(padded_s, b_sub, _LANES)
    s0_s = s0_s.reshape(b_sub, _LANES)
    s0_d = s0_d.reshape(b_sub, _LANES)

    seq_blk = pl.BlockSpec((chunk, tile_sub, _LANES), lambda b, c: (c, b, 0))
    vec_blk = pl.BlockSpec((tile_sub, _LANES), lambda b, c: (b, 0))
    smem = pl.BlockSpec(memory_space=pltpu.MemorySpace.SMEM)

    unroll = True if chunk <= 16 else 8
    kernel = functools.partial(_fsrs_kernel, seq_len=seq_len, unroll=unroll)

    # scoped-VMEM estimate: 4 streamed blocks double-buffered + resident vectors
    blk_bytes = chunk * tile_sub * _LANES * 4
    vec_bytes = tile_sub * _LANES * 4
    vmem_est = 4 * 2 * blk_bytes + 10 * vec_bytes
    vmem_limit = int(min(max(32 * 2**20, 2 * vmem_est), 100 * 2**20))

    out_s, out_d, fin_s, fin_d = pl.pallas_call(
        kernel,
        out_shape=(
            jax.ShapeDtypeStruct((padded_s, b_sub, _LANES), jnp.float32),
            jax.ShapeDtypeStruct((padded_s, b_sub, _LANES), jnp.float32),
            jax.ShapeDtypeStruct((b_sub, _LANES), jnp.float32),
            jax.ShapeDtypeStruct((b_sub, _LANES), jnp.float32),
        ),
        grid_spec=pltpu.PrefetchScalarGridSpec(
            num_scalar_prefetch=0,
            grid=(num_tiles, num_chunks),
            in_specs=[smem, smem, seq_blk, seq_blk, vec_blk, vec_blk],
            out_specs=(seq_blk, seq_blk, vec_blk, vec_blk),
            scratch_shapes=[pltpu.VMEM((tile_sub, _LANES), jnp.float32),
                            pltpu.VMEM((tile_sub, _LANES), jnp.float32)]),
        compiler_params=pltpu.CompilerParams(
            dimension_semantics=("parallel", "arbitrary"),
            vmem_limit_bytes=vmem_limit),
    )(flag, w, t, x, s0_s, s0_d)

    out_s = out_s.reshape(padded_s, padded_b)[:seq_len, :batch]
    out_d = out_d.reshape(padded_s, padded_b)[:seq_len, :batch]
    final = jnp.stack([fin_s.reshape(padded_b)[:batch],
                       fin_d.reshape(padded_b)[:batch]], axis=-1)
    if interleave_outputs:
        return jnp.stack([out_s, out_d], axis=-1), final
    return (out_s, out_d), final


def _ref_forward(w, inputs, state):
    """Pure-JAX reference mirroring the PyTorch module, for validation."""
    def step(state, X):
        t, rating = X[:, 0], X[:, 1]
        stab, diff = state[:, 0], state[:, 1]
        is_zero = jnp.sum(jnp.abs(state)) == 0.0

        new_s_init = w[0] + w[1] * (rating - 1.0)
        new_d_init = jnp.clip(w[2] + w[3] * (rating - 3.0), 1.0, 10.0)

        r = jnp.power(jnp.float32(0.9), t / stab)
        nd = diff + w[4] * (rating - 3.0)
        nd = w[5] * w[2] + (1.0 - w[5]) * nd
        nd = jnp.clip(nd, 1.0, 10.0)
        s_succ = stab * (1.0 + jnp.exp(w[6]) * (11.0 - nd) * jnp.power(stab, w[7])
                         * (jnp.exp((1.0 - r) * w[8]) - 1.0))
        s_fail = (w[9] * jnp.power(nd, w[10]) * jnp.power(stab, w[11])
                  * jnp.exp((1.0 - r) * w[12]))
        ns_else = jnp.where(rating > 1.0, s_succ, s_fail)

        new_s = jnp.where(is_zero, new_s_init, ns_else)
        new_d = jnp.where(is_zero, new_d_init, nd)
        new_s = jnp.clip(new_s, 0.1, 36500.0)
        new_state = jnp.stack([new_s, new_d], axis=1)
        return new_state, new_state

    fin, outs = lax.scan(step, state, inputs)
    return outs, fin


def _make_inputs(key, seq_len, batch):
    k_t, k_r = jax.random.split(key)
    elapsed = jnp.round(jax.random.uniform(k_t, (seq_len, batch), jnp.float32) * 30.0)
    rating = jax.random.randint(k_r, (seq_len, batch), 1, 5).astype(jnp.float32)
    return jnp.stack([elapsed, rating], axis=-1)   # [seq_len, batch, 2]


if __name__ == "__main__":
    key = jax.random.PRNGKey(0)
    k1, k2, k3, k4 = jax.random.split(key, 4)
    w = jnp.asarray(INIT_W, dtype=jnp.float32)

    # case 1: small shapes, fresh (all-zero) initial state
    seq_len, batch = 8, 8
    inputs = _make_inputs(k1, seq_len, batch)
    outputs, final_state = fsrs_v3_forward(w, inputs)
    jax.block_until_ready((outputs, final_state))
    ref_out, ref_fin = _ref_forward(w, inputs, jnp.zeros((batch, 2), jnp.float32))
    assert outputs.shape == (seq_len, batch, 2)
    assert final_state.shape == (batch, 2)
    assert jnp.allclose(outputs, ref_out, rtol=1e-3, atol=1e-3)
    assert jnp.allclose(final_state, ref_fin, rtol=1e-3, atol=1e-3)

    # case 2: non-zero initial state (exercises the "existing state" path at step 0)
    init_state = jnp.stack(
        [jax.random.uniform(k2, (batch,), jnp.float32, 0.5, 20.0),
         jax.random.uniform(k3, (batch,), jnp.float32, 1.0, 10.0)], axis=-1)
    outputs2, final2 = fsrs_v3_forward(w, inputs, init_state)
    jax.block_until_ready((outputs2, final2))
    ref_out2, ref_fin2 = _ref_forward(w, inputs, init_state)
    assert jnp.allclose(outputs2, ref_out2, rtol=1e-3, atol=1e-3)
    assert jnp.allclose(final2, ref_fin2, rtol=1e-3, atol=1e-3)

    # case 3: longer sequence + wider batch — exercises the seq-chunked VMEM carry,
    # the ragged seq tail and the 16-sublane batch tile.
    seq_len3, batch3 = 150, 1100
    inputs3 = _make_inputs(k4, seq_len3, batch3)
    outputs3, final3 = fsrs_v3_forward(w, inputs3)
    jax.block_until_ready((outputs3, final3))
    ref_out3, ref_fin3 = _ref_forward(w, inputs3, jnp.zeros((batch3, 2), jnp.float32))
    assert outputs3.shape == (seq_len3, batch3, 2)
    assert jnp.allclose(outputs3, ref_out3, rtol=2e-3, atol=2e-3)
    assert jnp.allclose(final3, ref_fin3, rtol=2e-3, atol=2e-3)

    print("KERNEL_OK")
</pallas_src>

<mosaic_0001>
module attributes {stable_mosaic.version = 11 : i64} {
  func.func @_fsrs_kernel(%arg0: i32, %arg1: i32, %arg2: memref<1xi32, #tpu.memory_space<smem>>, %arg3: memref<13xf32, #tpu.memory_space<smem>>, %arg4: memref<8x8x128xf32, #tpu.memory_space<vmem>>, %arg5: memref<8x8x128xf32, #tpu.memory_space<vmem>>, %arg6: memref<8x128xf32, #tpu.memory_space<vmem>>, %arg7: memref<8x128xf32, #tpu.memory_space<vmem>>, %arg8: memref<8x8x128xf32, #tpu.memory_space<vmem>>, %arg9: memref<8x8x128xf32, #tpu.memory_space<vmem>>, %arg10: memref<8x128xf32, #tpu.memory_space<vmem>>, %arg11: memref<8x128xf32, #tpu.memory_space<vmem>>, %arg12: memref<8x128xf32, #tpu.memory_space<vmem>>, %arg13: memref<8x128xf32, #tpu.memory_space<vmem>>) attributes {dimension_semantics = [#tpu.dimension_semantics<parallel>, #tpu.dimension_semantics<arbitrary>], iteration_bounds = array<i64: 1, 1>, scalar_prefetch = 0 : i64, scratch_operands = 2 : i64, tpu.core_type = #tpu.core_type<tc>, window_params = [{transform_indices = @transform_0, window_bounds = array<i64: 1>}, {transform_indices = @transform_1, window_bounds = array<i64: 13>}, {transform_indices = @transform_2, window_bounds = array<i64: 8, 8, 128>}, {transform_indices = @transform_3, window_bounds = array<i64: 8, 8, 128>}, {transform_indices = @transform_4, window_bounds = array<i64: 8, 128>}, {transform_indices = @transform_5, window_bounds = array<i64: 8, 128>}, {transform_indices = @transform_6, window_bounds = array<i64: 8, 8, 128>}, {transform_indices = @transform_7, window_bounds = array<i64: 8, 8, 128>}, {transform_indices = @transform_8, window_bounds = array<i64: 8, 128>}, {transform_indices = @transform_9, window_bounds = array<i64: 8, 128>}]} {
    %c0 = arith.constant 0 : index
    %0 = memref.load %arg3[%c0] : memref<13xf32, #tpu.memory_space<smem>>
    %c1 = arith.constant 1 : index
    %1 = memref.load %arg3[%c1] : memref<13xf32, #tpu.memory_space<smem>>
    %c2 = arith.constant 2 : index
    %2 = memref.load %arg3[%c2] : memref<13xf32, #tpu.memory_space<smem>>
    %c3 = arith.constant 3 : index
    %3 = memref.load %arg3[%c3] : memref<13xf32, #tpu.memory_space<smem>>
    %c4 = arith.constant 4 : index
    %4 = memref.load %arg3[%c4] : memref<13xf32, #tpu.memory_space<smem>>
    %c5 = arith.constant 5 : index
    %5 = memref.load %arg3[%c5] : memref<13xf32, #tpu.memory_space<smem>>
    %c6 = arith.constant 6 : index
    %6 = memref.load %arg3[%c6] : memref<13xf32, #tpu.memory_space<smem>>
    %c7 = arith.constant 7 : index
    %7 = memref.load %arg3[%c7] : memref<13xf32, #tpu.memory_space<smem>>
    %c8 = arith.constant 8 : index
    %8 = memref.load %arg3[%c8] : memref<13xf32, #tpu.memory_space<smem>>
    %c9 = arith.constant 9 : index
    %9 = memref.load %arg3[%c9] : memref<13xf32, #tpu.memory_space<smem>>
    %c10 = arith.constant 10 : index
    %10 = memref.load %arg3[%c10] : memref<13xf32, #tpu.memory_space<smem>>
    %c11 = arith.constant 11 : index
    %11 = memref.load %arg3[%c11] : memref<13xf32, #tpu.memory_space<smem>>
    %c12 = arith.constant 12 : index
    %12 = memref.load %arg3[%c12] : memref<13xf32, #tpu.memory_space<smem>>
    %13 = math.exp %6 : f32
    %14 = arith.mulf %5, %2 : f32
    %cst = arith.constant 1.000000e+00 : f32
    %15 = arith.subf %cst, %5 : f32
    %c0_0 = arith.constant 0 : index
    %16 = memref.load %arg2[%c0_0] : memref<1xi32, #tpu.memory_space<smem>>
    %c0_i32 = arith.constant 0 : i32
    %17 = arith.cmpi ne, %16, %c0_i32 : i32
    %c0_i32_1 = arith.constant 0 : i32
    %18 = arith.cmpi eq, %arg1, %c0_i32_1 : i32
    %19 = arith.extui %18 : i1 to i32
    %c0_i32_2 = arith.constant 0 : i32
    %20 = arith.cmpi ne, %19, %c0_i32_2 : i32
    scf.if %20 {
      %c0_192 = arith.constant 0 : index
      %c0_193 = arith.constant 0 : index
      %666 = vector.load %arg6[%c0_192, %c0_193] : memref<8x128xf32, #tpu.memory_space<vmem>>, vector<8x128xf32>
      %c0_194 = arith.constant 0 : index
      %c0_195 = arith.constant 0 : index
      %667 = vector.load %arg12[%c0_194, %c0_195] : memref<8x128xf32, #tpu.memory_space<vmem>>, vector<8x128xf32>
      tpu.vector_store %arg12[%c0_194, %c0_195], %666 {strides = array<i32>} : memref<8x128xf32, #tpu.memory_space<vmem>>, vector<8x128xf32>,
      %c0_196 = arith.constant 0 : index
      %c0_197 = arith.constant 0 : index
      %668 = vector.load %arg7[%c0_196, %c0_197] : memref<8x128xf32, #tpu.memory_space<vmem>>, vector<8x128xf32>
      %c0_198 = arith.constant 0 : index
      %c0_199 = arith.constant 0 : index
      %669 = vector.load %arg13[%c0_198, %c0_199] : memref<8x128xf32, #tpu.memory_space<vmem>>, vector<8x128xf32>
      tpu.vector_store %arg13[%c0_198, %c0_199], %668 {strides = array<i32>} : memref<8x128xf32, #tpu.memory_space<vmem>>, vector<8x128xf32>,
    } else {
    }
    %c0_3 = arith.constant 0 : index
    %c0_4 = arith.constant 0 : index
    %c0_5 = arith.constant 0 : index
    %21 = vector.load %arg4[%c0_3, %c0_4, %c0_5] : memref<8x8x128xf32, #tpu.memory_space<vmem>>, vector<1x8x128xf32>
    %22 = vector.shape_cast %21 : vector<1x8x128xf32> to vector<8x128xf32>
    %c0_6 = arith.constant 0 : index
    %c0_7 = arith.constant 0 : index
    %c0_8 = arith.constant 0 : index
    %23 = vector.load %arg5[%c0_6, %c0_7, %c0_8] : memref<8x8x128xf32, #tpu.memory_space<vmem>>, vector<1x8x128xf32>
    %24 = vector.shape_cast %23 : vector<1x8x128xf32> to vector<8x128xf32>
    %c0_9 = arith.constant 0 : index
    %c0_10 = arith.constant 0 : index
    %25 = vector.load %arg12[%c0_9, %c0_10] : memref<8x128xf32, #tpu.memory_space<vmem>>, vector<8x128xf32>
    %c0_11 = arith.constant 0 : index
    %c0_12 = arith.constant 0 : index
    %26 = vector.load %arg13[%c0_11, %c0_12] : memref<8x128xf32, #tpu.memory_space<vmem>>, vector<8x128xf32>
    %27 = tpu.reciprocal %25 {approx = true} : vector<8x128xf32> -> vector<8x128xf32>
    %28 = arith.mulf %25, %27 : vector<8x128xf32>
    %cst_13 = arith.constant 2.000000e+00 : f32
    %29 = vector.broadcast %cst_13 : f32 to vector<8x128xf32>
    %30 = arith.subf %29, %28 : vector<8x128xf32>
    %31 = arith.mulf %27, %30 : vector<8x128xf32>
    %32 = arith.mulf %22, %31 : vector<8x128xf32>
    %33 = math.exp %32 : vector<8x128xf32>
    %cst_14 = arith.constant 3.000000e+00 : f32
    %34 = vector.broadcast %cst_14 : f32 to vector<8x128xf32>
    %35 = arith.subf %24, %34 : vector<8x128xf32>
    %36 = vector.broadcast %4 : f32 to vector<8x128xf32>
    %37 = arith.mulf %36, %35 : vector<8x128xf32>
    %38 = arith.addf %26, %37 : vector<8x128xf32>
    %39 = vector.broadcast %15 : f32 to vector<8x128xf32>
    %40 = arith.mulf %39, %38 : vector<8x128xf32>
    %41 = vector.broadcast %14 : f32 to vector<8x128xf32>
    %42 = arith.addf %41, %40 : vector<8x128xf32>
    %cst_15 = arith.constant 1.000000e+00 : f32
    %cst_16 = arith.constant 1.000000e+01 : f32
    %43 = vector.broadcast %cst_15 : f32 to vector<8x128xf32>
    %44 = arith.maximumf %43, %42 : vector<8x128xf32>
    %45 = vector.broadcast %cst_16 : f32 to vector<8x128xf32>
    %46 = arith.minimumf %45, %44 : vector<8x128xf32>
    %47 = math.log %25 : vector<8x128xf32>
    %48 = math.log %46 : vector<8x128xf32>
    %cst_17 = arith.constant 1.000000e+00 : f32
    %49 = vector.broadcast %cst_17 : f32 to vector<8x128xf32>
    %50 = arith.subf %49, %33 : vector<8x128xf32>
    %cst_18 = arith.constant 1.100000e+01 : f32
    %51 = vector.broadcast %cst_18 : f32 to vector<8x128xf32>
    %52 = arith.subf %51, %46 : vector<8x128xf32>
    %53 = vector.broadcast %13 : f32 to vector<8x128xf32>
    %54 = arith.mulf %53, %52 : vector<8x128xf32>
    %55 = vector.broadcast %7 : f32 to vector<8x128xf32>
    %56 = arith.mulf %55, %47 : vector<8x128xf32>
    %57 = math.exp %56 : vector<8x128xf32>
    %58 = arith.mulf %54, %57 : vector<8x128xf32>
    %59 = vector.broadcast %8 : f32 to vector<8x128xf32>
    %60 = arith.mulf %50, %59 : vector<8x128xf32>
    %61 = math.exp %60 : vector<8x128xf32>
    %cst_19 = arith.constant 1.000000e+00 : f32
    %62 = vector.broadcast %cst_19 : f32 to vector<8x128xf32>
    %63 = arith.subf %61, %62 : vector<8x128xf32>
    %64 = arith.mulf %58, %63 : vector<8x128xf32>
    %cst_20 = arith.constant 1.000000e+00 : f32
    %65 = vector.broadcast %cst_20 : f32 to vector<8x128xf32>
    %66 = arith.addf %65, %64 : vector<8x128xf32>
    %67 = arith.mulf %25, %66 : vector<8x128xf32>
    %68 = vector.broadcast %10 : f32 to vector<8x128xf32>
    %69 = arith.mulf %68, %48 : vector<8x128xf32>
    %70 = vector.broadcast %11 : f32 to vector<8x128xf32>
    %71 = arith.mulf %70, %47 : vector<8x128xf32>
    %72 = arith.addf %69, %71 : vector<8x128xf32>
    %73 = vector.broadcast %12 : f32 to vector<8x128xf32>
    %74 = arith.mulf %50, %73 : vector<8x128xf32>
    %75 = arith.addf %72, %74 : vector<8x128xf32>
    %76 = math.exp %75 : vector<8x128xf32>
    %77 = vector.broadcast %9 : f32 to vector<8x128xf32>
    %78 = arith.mulf %77, %76 : vector<8x128xf32>
    %cst_21 = arith.constant 1.000000e+00 : f32
    %79 = vector.broadcast %cst_21 : f32 to vector<8x128xf32>
    %80 = arith.cmpf ogt, %24, %79 : vector<8x128xf32>
    %81 = arith.select %80, %67, %78 : vector<8x128xi1>, vector<8x128xf32>
    %cst_22 = arith.constant 1.000000e-01 : f32
    %cst_23 = arith.constant 3.650000e+04 : f32
    %82 = vector.broadcast %cst_22 : f32 to vector<8x128xf32>
    %83 = arith.maximumf %82, %81 : vector<8x128xf32>
    %84 = vector.broadcast %cst_23 : f32 to vector<8x128xf32>
    %85 = arith.minimumf %84, %83 : vector<8x128xf32>
    %c0_i32_24 = arith.constant 0 : i32
    %86 = arith.cmpi eq, %arg1, %c0_i32_24 : i32
    %87 = arith.andi %86, %17 : i1
    %cst_25 = arith.constant 1.000000e+00 : f32
    %88 = vector.broadcast %cst_25 : f32 to vector<8x128xf32>
    %89 = arith.subf %24, %88 : vector<8x128xf32>
    %90 = vector.broadcast %1 : f32 to vector<8x128xf32>
    %91 = arith.mulf %90, %89 : vector<8x128xf32>
    %92 = vector.broadcast %0 : f32 to vector<8x128xf32>
    %93 = arith.addf %92, %91 : vector<8x128xf32>
    %cst_26 = arith.constant 1.000000e-01 : f32
    %cst_27 = arith.constant 3.650000e+04 : f32
    %94 = vector.broadcast %cst_26 : f32 to vector<8x128xf32>
    %95 = arith.maximumf %94, %93 : vector<8x128xf32>
    %96 = vector.broadcast %cst_27 : f32 to vector<8x128xf32>
    %97 = arith.minimumf %96, %95 : vector<8x128xf32>
    %cst_28 = arith.constant 3.000000e+00 : f32
    %98 = vector.broadcast %cst_28 : f32 to vector<8x128xf32>
    %99 = arith.subf %24, %98 : vector<8x128xf32>
    %100 = vector.broadcast %3 : f32 to vector<8x128xf32>
    %101 = arith.mulf %100, %99 : vector<8x128xf32>
    %102 = vector.broadcast %2 : f32 to vector<8x128xf32>
    %103 = arith.addf %102, %101 : vector<8x128xf32>
    %cst_29 = arith.constant 1.000000e+00 : f32
    %cst_30 = arith.constant 1.000000e+01 : f32
    %104 = vector.broadcast %cst_29 : f32 to vector<8x128xf32>
    %105 = arith.maximumf %104, %103 : vector<8x128xf32>
    %106 = vector.broadcast %cst_30 : f32 to vector<8x128xf32>
    %107 = arith.minimumf %106, %105 : vector<8x128xf32>
    %108 = arith.select %87, %97, %85 : vector<8x128xf32>
    %109 = arith.select %87, %107, %46 : vector<8x128xf32>
    %c0_31 = arith.constant 0 : index
    %c0_32 = arith.constant 0 : index
    %c0_33 = arith.constant 0 : index
    %110 = vector.load %arg8[%c0_31, %c0_32, %c0_33] : memref<8x8x128xf32, #tpu.memory_space<vmem>>, vector<1x8x128xf32>
    %111 = vector.shape_cast %110 : vector<1x8x128xf32> to vector<8x128xf32>
    %112 = vector.shape_cast %108 : vector<8x128xf32> to vector<1x8x128xf32>
    tpu.vector_store %arg8[%c0_31, %c0_32, %c0_33], %112 {strides = array<i32>} : memref<8x8x128xf32, #tpu.memory_space<vmem>>, vector<1x8x128xf32>,
    %c0_34 = arith.constant 0 : index
    %c0_35 = arith.constant 0 : index
    %c0_36 = arith.constant 0 : index
    %113 = vector.load %arg9[%c0_34, %c0_35, %c0_36] : memref<8x8x128xf32, #tpu.memory_space<vmem>>, vector<1x8x128xf32>
    %114 = vector.shape_cast %113 : vector<1x8x128xf32> to vector<8x128xf32>
    %115 = vector.shape_cast %109 : vector<8x128xf32> to vector<1x8x128xf32>
    tpu.vector_store %arg9[%c0_34, %c0_35, %c0_36], %115 {strides = array<i32>} : memref<8x8x128xf32, #tpu.memory_space<vmem>>, vector<1x8x128xf32>,
    %c1_i32 = arith.constant 1 : i32
    %116 = arith.index_cast %c1_i32 : i32 to index
    %c0_37 = arith.constant 0 : index
    %c0_38 = arith.constant 0 : index
    %117 = vector.load %arg4[%116, %c0_37, %c0_38] : memref<8x8x128xf32, #tpu.memory_space<vmem>>, vector<1x8x128xf32>
    %118 = vector.shape_cast %117 : vector<1x8x128xf32> to vector<8x128xf32>
    %119 = arith.index_cast %c1_i32 : i32 to index
    %c0_39 = arith.constant 0 : index
    %c0_40 = arith.constant 0 : index
    %120 = vector.load %arg5[%119, %c0_39, %c0_40] : memref<8x8x128xf32, #tpu.memory_space<vmem>>, vector<1x8x128xf32>
    %121 = vector.shape_cast %120 : vector<1x8x128xf32> to vector<8x128xf32>
    %122 = tpu.reciprocal %108 {approx = true} : vector<8x128xf32> -> vector<8x128xf32>
    %123 = arith.mulf %108, %122 : vector<8x128xf32>
    %cst_41 = arith.constant 2.000000e+00 : f32
    %124 = vector.broadcast %cst_41 : f32 to vector<8x128xf32>
    %125 = arith.subf %124, %123 : vector<8x128xf32>
    %126 = arith.mulf %122, %125 : vector<8x128xf32>
    %127 = arith.mulf %118, %126 : vector<8x128xf32>
    %128 = math.exp %127 : vector<8x128xf32>
    %cst_42 = arith.constant 3.000000e+00 : f32
    %129 = vector.broadcast %cst_42 : f32 to vector<8x128xf32>
    %130 = arith.subf %121, %129 : vector<8x128xf32>
    %131 = vector.broadcast %4 : f32 to vector<8x128xf32>
    %132 = arith.mulf %131, %130 : vector<8x128xf32>
    %133 = arith.addf %109, %132 : vector<8x128xf32>
    %134 = vector.broadcast %15 : f32 to vector<8x128xf32>
    %135 = arith.mulf %134, %133 : vector<8x128xf32>
    %136 = vector.broadcast %14 : f32 to vector<8x128xf32>
    %137 = arith.addf %136, %135 : vector<8x128xf32>
    %cst_43 = arith.constant 1.000000e+00 : f32
    %cst_44 = arith.constant 1.000000e+01 : f32
    %138 = vector.broadcast %cst_43 : f32 to vector<8x128xf32>
    %139 = arith.maximumf %138, %137 : vector<8x128xf32>
    %140 = vector.broadcast %cst_44 : f32 to vector<8x128xf32>
    %141 = arith.minimumf %140, %139 : vector<8x128xf32>
    %142 = math.log %108 : vector<8x128xf32>
    %143 = math.log %141 : vector<8x128xf32>
    %cst_45 = arith.constant 1.000000e+00 : f32
    %144 = vector.broadcast %cst_45 : f32 to vector<8x128xf32>
    %145 = arith.subf %144, %128 : vector<8x128xf32>
    %cst_46 = arith.constant 1.100000e+01 : f32
    %146 = vector.broadcast %cst_46 : f32 to vector<8x128xf32>
    %147 = arith.subf %146, %141 : vector<8x128xf32>
    %148 = vector.broadcast %13 : f32 to vector<8x128xf32>
    %149 = arith.mulf %148, %147 : vector<8x128xf32>
    %150 = vector.broadcast %7 : f32 to vector<8x128xf32>
    %151 = arith.mulf %150, %142 : vector<8x128xf32>
    %152 = math.exp %151 : vector<8x128xf32>
    %153 = arith.mulf %149, %152 : vector<8x128xf32>
    %154 = vector.broadcast %8 : f32 to vector<8x128xf32>
    %155 = arith.mulf %145, %154 : vector<8x128xf32>
    %156 = math.exp %155 : vector<8x128xf32>
    %cst_47 = arith.constant 1.000000e+00 : f32
    %157 = vector.broadcast %cst_47 : f32 to vector<8x128xf32>
    %158 = arith.subf %156, %157 : vector<8x128xf32>
    %159 = arith.mulf %153, %158 : vector<8x128xf32>
    %cst_48 = arith.constant 1.000000e+00 : f32
    %160 = vector.broadcast %cst_48 : f32 to vector<8x128xf32>
    %161 = arith.addf %160, %159 : vector<8x128xf32>
    %162 = arith.mulf %108, %161 : vector<8x128xf32>
    %163 = vector.broadcast %10 : f32 to vector<8x128xf32>
    %164 = arith.mulf %163, %143 : vector<8x128xf32>
    %165 = vector.broadcast %11 : f32 to vector<8x128xf32>
    %166 = arith.mulf %165, %142 : vector<8x128xf32>
    %167 = arith.addf %164, %166 : vector<8x128xf32>
    %168 = vector.broadcast %12 : f32 to vector<8x128xf32>
    %169 = arith.mulf %145, %168 : vector<8x128xf32>
    %170 = arith.addf %167, %169 : vector<8x128xf32>
    %171 = math.exp %170 : vector<8x128xf32>
    %172 = vector.broadcast %9 : f32 to vector<8x128xf32>
    %173 = arith.mulf %172, %171 : vector<8x128xf32>
    %cst_49 = arith.constant 1.000000e+00 : f32
    %174 = vector.broadcast %cst_49 : f32 to vector<8x128xf32>
    %175 = arith.cmpf ogt, %121, %174 : vector<8x128xf32>
    %176 = arith.select %175, %162, %173 : vector<8x128xi1>, vector<8x128xf32>
    %cst_50 = arith.constant 1.000000e-01 : f32
    %cst_51 = arith.constant 3.650000e+04 : f32
    %177 = vector.broadcast %cst_50 : f32 to vector<8x128xf32>
    %178 = arith.maximumf %177, %176 : vector<8x128xf32>
    %179 = vector.broadcast %cst_51 : f32 to vector<8x128xf32>
    %180 = arith.minimumf %179, %178 : vector<8x128xf32>
    %181 = arith.index_cast %c1_i32 : i32 to index
    %c0_52 = arith.constant 0 : index
    %c0_53 = arith.constant 0 : index
    %182 = vector.load %arg8[%181, %c0_52, %c0_53] : memref<8x8x128xf32, #tpu.memory_space<vmem>>, vector<1x8x128xf32>
    %183 = vector.shape_cast %182 : vector<1x8x128xf32> to vector<8x128xf32>
    %184 = vector.shape_cast %180 : vector<8x128xf32> to vector<1x8x128xf32>
    tpu.vector_store %arg8[%181, %c0_52, %c0_53], %184 {strides = array<i32>} : memref<8x8x128xf32, #tpu.memory_space<vmem>>, vector<1x8x128xf32>,
    %185 = arith.index_cast %c1_i32 : i32 to index
    %c0_54 = arith.constant 0 : index
    %c0_55 = arith.constant 0 : index
    %186 = vector.load %arg9[%185, %c0_54, %c0_55] : memref<8x8x128xf32, #tpu.memory_space<vmem>>, vector<1x8x128xf32>
    %187 = vector.shape_cast %186 : vector<1x8x128xf32> to vector<8x128xf32>
    %188 = vector.shape_cast %141 : vector<8x128xf32> to vector<1x8x128xf32>
    tpu.vector_store %arg9[%185, %c0_54, %c0_55], %188 {strides = array<i32>} : memref<8x8x128xf32, #tpu.memory_space<vmem>>, vector<1x8x128xf32>,
    %c8_i32 = arith.constant 8 : i32
    %189 = arith.muli %arg1, %c8_i32 : i32
    %190 = arith.addi %189, %c1_i32 : i32
    %c8_i32_56 = arith.constant 8 : i32
    %191 = arith.cmpi slt, %190, %c8_i32_56 : i32
    %192 = arith.select %191, %180, %108 : vector<8x128xf32>
    %193 = arith.select %191, %141, %109 : vector<8x128xf32>
    %c2_i32 = arith.constant 2 : i32
    %194 = arith.index_cast %c2_i32 : i32 to index
    %c0_57 = arith.constant 0 : index
    %c0_58 = arith.constant 0 : index
    %195 = vector.load %arg4[%194, %c0_57, %c0_58] : memref<8x8x128xf32, #tpu.memory_space<vmem>>, vector<1x8x128xf32>
    %196 = vector.shape_cast %195 : vector<1x8x128xf32> to vector<8x128xf32>
    %197 = arith.index_cast %c2_i32 : i32 to index
    %c0_59 = arith.constant 0 : index
    %c0_60 = arith.constant 0 : index
    %198 = vector.load %arg5[%197, %c0_59, %c0_60] : memref<8x8x128xf32, #tpu.memory_space<vmem>>, vector<1x8x128xf32>
    %199 = vector.shape_cast %198 : vector<1x8x128xf32> to vector<8x128xf32>
    %200 = tpu.reciprocal %192 {approx = true} : vector<8x128xf32> -> vector<8x128xf32>
    %201 = arith.mulf %192, %200 : vector<8x128xf32>
    %cst_61 = arith.constant 2.000000e+00 : f32
    %202 = vector.broadcast %cst_61 : f32 to vector<8x128xf32>
    %203 = arith.subf %202, %201 : vector<8x128xf32>
    %204 = arith.mulf %200, %203 : vector<8x128xf32>
    %205 = arith.mulf %196, %204 : vector<8x128xf32>
    %206 = math.exp %205 : vector<8x128xf32>
    %cst_62 = arith.constant 3.000000e+00 : f32
    %207 = vector.broadcast %cst_62 : f32 to vector<8x128xf32>
    %208 = arith.subf %199, %207 : vector<8x128xf32>
    %209 = vector.broadcast %4 : f32 to vector<8x128xf32>
    %210 = arith.mulf %209, %208 : vector<8x128xf32>
    %211 = arith.addf %193, %210 : vector<8x128xf32>
    %212 = vector.broadcast %15 : f32 to vector<8x128xf32>
    %213 = arith.mulf %212, %211 : vector<8x128xf32>
    %214 = vector.broadcast %14 : f32 to vector<8x128xf32>
    %215 = arith.addf %214, %213 : vector<8x128xf32>
    %cst_63 = arith.constant 1.000000e+00 : f32
    %cst_64 = arith.constant 1.000000e+01 : f32
    %216 = vector.broadcast %cst_63 : f32 to vector<8x128xf32>
    %217 = arith.maximumf %216, %215 : vector<8x128xf32>
    %218 = vector.broadcast %cst_64 : f32 to vector<8x128xf32>
    %219 = arith.minimumf %218, %217 : vector<8x128xf32>
    %220 = math.log %192 : vector<8x128xf32>
    %221 = math.log %219 : vector<8x128xf32>
    %cst_65 = arith.constant 1.000000e+00 : f32
    %222 = vector.broadcast %cst_65 : f32 to vector<8x128xf32>
    %223 = arith.subf %222, %206 : vector<8x128xf32>
    %cst_66 = arith.constant 1.100000e+01 : f32
    %224 = vector.broadcast %cst_66 : f32 to vector<8x128xf32>
    %225 = arith.subf %224, %219 : vector<8x128xf32>
    %226 = vector.broadcast %13 : f32 to vector<8x128xf32>
    %227 = arith.mulf %226, %225 : vector<8x128xf32>
    %228 = vector.broadcast %7 : f32 to vector<8x128xf32>
    %229 = arith.mulf %228, %220 : vector<8x128xf32>
    %230 = math.exp %229 : vector<8x128xf32>
    %231 = arith.mulf %227, %230 : vector<8x128xf32>
    %232 = vector.broadcast %8 : f32 to vector<8x128xf32>
    %233 = arith.mulf %223, %232 : vector<8x128xf32>
    %234 = math.exp %233 : vector<8x128xf32>
    %cst_67 = arith.constant 1.000000e+00 : f32
    %235 = vector.broadcast %cst_67 : f32 to vector<8x128xf32>
    %236 = arith.subf %234, %235 : vector<8x128xf32>
    %237 = arith.mulf %231, %236 : vector<8x128xf32>
    %cst_68 = arith.constant 1.000000e+00 : f32
    %238 = vector.broadcast %cst_68 : f32 to vector<8x128xf32>
    %239 = arith.addf %238, %237 : vector<8x128xf32>
    %240 = arith.mulf %192, %239 : vector<8x128xf32>
    %241 = vector.broadcast %10 : f32 to vector<8x128xf32>
    %242 = arith.mulf %241, %221 : vector<8x128xf32>
    %243 = vector.broadcast %11 : f32 to vector<8x128xf32>
    %244 = arith.mulf %243, %220 : vector<8x128xf32>
    %245 = arith.addf %242, %244 : vector<8x128xf32>
    %246 = vector.broadcast %12 : f32 to vector<8x128xf32>
    %247 = arith.mulf %223, %246 : vector<8x128xf32>
    %248 = arith.addf %245, %247 : vector<8x128xf32>
    %249 = math.exp %248 : vector<8x128xf32>
    %250 = vector.broadcast %9 : f32 to vector<8x128xf32>
    %251 = arith.mulf %250, %249 : vector<8x128xf32>
    %cst_69 = arith.constant 1.000000e+00 : f32
    %252 = vector.broadcast %cst_69 : f32 to vector<8x128xf32>
    %253 = arith.cmpf ogt, %199, %252 : vector<8x128xf32>
    %254 = arith.select %253, %240, %251 : vector<8x128xi1>, vector<8x128xf32>
    %cst_70 = arith.constant 1.000000e-01 : f32
    %cst_71 = arith.constant 3.650000e+04 : f32
    %255 = vector.broadcast %cst_70 : f32 to vector<8x128xf32>
    %256 = arith.maximumf %255, %254 : vector<8x128xf32>
    %257 = vector.broadcast %cst_71 : f32 to vector<8x128xf32>
    %258 = arith.minimumf %257, %256 : vector<8x128xf32>
    %259 = arith.index_cast %c2_i32 : i32 to index
    %c0_72 = arith.constant 0 : index
    %c0_73 = arith.constant 0 : index
    %260 = vector.load %arg8[%259, %c0_72, %c0_73] : memref<8x8x128xf32, #tpu.memory_space<vmem>>, vector<1x8x128xf32>
    %261 = vector.shape_cast %260 : vector<1x8x128xf32> to vector<8x128xf32>
    %262 = vector.shape_cast %258 : vector<8x128xf32> to vector<1x8x128xf32>
    tpu.vector_store %arg8[%259, %c0_72, %c0_73], %262 {strides = array<i32>} : memref<8x8x128xf32, #tpu.memory_space<vmem>>, vector<1x8x128xf32>,
    %263 = arith.index_cast %c2_i32 : i32 to index
    %c0_74 = arith.constant 0 : index
    %c0_75 = arith.constant 0 : index
    %264 = vector.load %arg9[%263, %c0_74, %c0_75] : memref<8x8x128xf32, #tpu.memory_space<vmem>>, vector<1x8x128xf32>
    %265 = vector.shape_cast %264 : vector<1x8x128xf32> to vector<8x128xf32>
    %266 = vector.shape_cast %219 : vector<8x128xf32> to vector<1x8x128xf32>
    tpu.vector_store %arg9[%263, %c0_74, %c0_75], %266 {strides = array<i32>} : memref<8x8x128xf32, #tpu.memory_space<vmem>>, vector<1x8x128xf32>,
    %c8_i32_76 = arith.constant 8 : i32
    %267 = arith.muli %arg1, %c8_i32_76 : i32
    %268 = arith.addi %267, %c2_i32 : i32
    %c8_i32_77 = arith.constant 8 : i32
    %269 = arith.cmpi slt, %268, %c8_i32_77 : i32
    %270 = arith.select %269, %258, %192 : vector<8x128xf32>
    %271 = arith.select %269, %219, %193 : vector<8x128xf32>
    %c3_i32 = arith.constant 3 : i32
    %272 = arith.index_cast %c3_i32 : i32 to index
    %c0_78 = arith.constant 0 : index
    %c0_79 = arith.constant 0 : index
    %273 = vector.load %arg4[%272, %c0_78, %c0_79] : memref<8x8x128xf32, #tpu.memory_space<vmem>>, vector<1x8x128xf32>
    %274 = vector.shape_cast %273 : vector<1x8x128xf32> to vector<8x128xf32>
    %275 = arith.index_cast %c3_i32 : i32 to index
    %c0_80 = arith.constant 0 : index
    %c0_81 = arith.constant 0 : index
    %276 = vector.load %arg5[%275, %c0_80, %c0_81] : memref<8x8x128xf32, #tpu.memory_space<vmem>>, vector<1x8x128xf32>
    %277 = vector.shape_cast %276 : vector<1x8x128xf32> to vector<8x128xf32>
    %278 = tpu.reciprocal %270 {approx = true} : vector<8x128xf32> -> vector<8x128xf32>
    %279 = arith.mulf %270, %278 : vector<8x128xf32>
    %cst_82 = arith.constant 2.000000e+00 : f32
    %280 = vector.broadcast %cst_82 : f32 to vector<8x128xf32>
    %281 = arith.subf %280, %279 : vector<8x128xf32>
    %282 = arith.mulf %278, %281 : vector<8x128xf32>
    %283 = arith.mulf %274, %282 : vector<8x128xf32>
    %284 = math.exp %283 : vector<8x128xf32>
    %cst_83 = arith.constant 3.000000e+00 : f32
    %285 = vector.broadcast %cst_83 : f32 to vector<8x128xf32>
    %286 = arith.subf %277, %285 : vector<8x128xf32>
    %287 = vector.broadcast %4 : f32 to vector<8x128xf32>
    %288 = arith.mulf %287, %286 : vector<8x128xf32>
    %289 = arith.addf %271, %288 : vector<8x128xf32>
    %290 = vector.broadcast %15 : f32 to vector<8x128xf32>
    %291 = arith.mulf %290, %289 : vector<8x128xf32>
    %292 = vector.broadcast %14 : f32 to vector<8x128xf32>
    %293 = arith.addf %292, %291 : vector<8x128xf32>
    %cst_84 = arith.constant 1.000000e+00 : f32
    %cst_85 = arith.constant 1.000000e+01 : f32
    %294 = vector.broadcast %cst_84 : f32 to vector<8x128xf32>
    %295 = arith.maximumf %294, %293 : vector<8x128xf32>
    %296 = vector.broadcast %cst_85 : f32 to vector<8x128xf32>
    %297 = arith.minimumf %296, %295 : vector<8x128xf32>
    %298 = math.log %270 : vector<8x128xf32>
    %299 = math.log %297 : vector<8x128xf32>
    %cst_86 = arith.constant 1.000000e+00 : f32
    %300 = vector.broadcast %cst_86 : f32 to vector<8x128xf32>
    %301 = arith.subf %300, %284 : vector<8x128xf32>
    %cst_87 = arith.constant 1.100000e+01 : f32
    %302 = vector.broadcast %cst_87 : f32 to vector<8x128xf32>
    %303 = arith.subf %302, %297 : vector<8x128xf32>
    %304 = vector.broadcast %13 : f32 to vector<8x128xf32>
    %305 = arith.mulf %304, %303 : vector<8x128xf32>
    %306 = vector.broadcast %7 : f32 to vector<8x128xf32>
    %307 = arith.mulf %306, %298 : vector<8x128xf32>
    %308 = math.exp %307 : vector<8x128xf32>
    %309 = arith.mulf %305, %308 : vector<8x128xf32>
    %310 = vector.broadcast %8 : f32 to vector<8x128xf32>
    %311 = arith.mulf %301, %310 : vector<8x128xf32>
    %312 = math.exp %311 : vector<8x128xf32>
    %cst_88 = arith.constant 1.000000e+00 : f32
    %313 = vector.broadcast %cst_88 : f32 to vector<8x128xf32>
    %314 = arith.subf %312, %313 : vector<8x128xf32>
    %315 = arith.mulf %309, %314 : vector<8x128xf32>
    %cst_89 = arith.constant 1.000000e+00 : f32
    %316 = vector.broadcast %cst_89 : f32 to vector<8x128xf32>
    %317 = arith.addf %316, %315 : vector<8x128xf32>
    %318 = arith.mulf %270, %317 : vector<8x128xf32>
    %319 = vector.broadcast %10 : f32 to vector<8x128xf32>
    %320 = arith.mulf %319, %299 : vector<8x128xf32>
    %321 = vector.broadcast %11 : f32 to vector<8x128xf32>
    %322 = arith.mulf %321, %298 : vector<8x128xf32>
    %323 = arith.addf %320, %322 : vector<8x128xf32>
    %324 = vector.broadcast %12 : f32 to vector<8x128xf32>
    %325 = arith.mulf %301, %324 : vector<8x128xf32>
    %326 = arith.addf %323, %325 : vector<8x128xf32>
    %327 = math.exp %326 : vector<8x128xf32>
    %328 = vector.broadcast %9 : f32 to vector<8x128xf32>
    %329 = arith.mulf %328, %327 : vector<8x128xf32>
    %cst_90 = arith.constant 1.000000e+00 : f32
    %330 = vector.broadcast %cst_90 : f32 to vector<8x128xf32>
    %331 = arith.cmpf ogt, %277, %330 : vector<8x128xf32>
    %332 = arith.select %331, %318, %329 : vector<8x128xi1>, vector<8x128xf32>
    %cst_91 = arith.constant 1.000000e-01 : f32
    %cst_92 = arith.constant 3.650000e+04 : f32
    %333 = vector.broadcast %cst_91 : f32 to vector<8x128xf32>
    %334 = arith.maximumf %333, %332 : vector<8x128xf32>
    %335 = vector.broadcast %cst_92 : f32 to vector<8x128xf32>
    %336 = arith.minimumf %335, %334 : vector<8x128xf32>
    %337 = arith.index_cast %c3_i32 : i32 to index
    %c0_93 = arith.constant 0 : index
    %c0_94 = arith.constant 0 : index
    %338 = vector.load %arg8[%337, %c0_93, %c0_94] : memref<8x8x128xf32, #tpu.memory_space<vmem>>, vector<1x8x128xf32>
    %339 = vector.shape_cast %338 : vector<1x8x128xf32> to vector<8x128xf32>
    %340 = vector.shape_cast %336 : vector<8x128xf32> to vector<1x8x128xf32>
    tpu.vector_store %arg8[%337, %c0_93, %c0_94], %340 {strides = array<i32>} : memref<8x8x128xf32, #tpu.memory_space<vmem>>, vector<1x8x128xf32>,
    %341 = arith.index_cast %c3_i32 : i32 to index
    %c0_95 = arith.constant 0 : index
    %c0_96 = arith.constant 0 : index
    %342 = vector.load %arg9[%341, %c0_95, %c0_96] : memref<8x8x128xf32, #tpu.memory_space<vmem>>, vector<1x8x128xf32>
    %343 = vector.shape_cast %342 : vector<1x8x128xf32> to vector<8x128xf32>
    %344 = vector.shape_cast %297 : vector<8x128xf32> to vector<1x8x128xf32>
    tpu.vector_store %arg9[%341, %c0_95, %c0_96], %344 {strides = array<i32>} : memref<8x8x128xf32, #tpu.memory_space<vmem>>, vector<1x8x128xf32>,
    %c8_i32_97 = arith.constant 8 : i32
    %345 = arith.muli %arg1, %c8_i32_97 : i32
    %346 = arith.addi %345, %c3_i32 : i32
    %c8_i32_98 = arith.constant 8 : i32
    %347 = arith.cmpi slt, %346, %c8_i32_98 : i32
    %348 = arith.select %347, %336, %270 : vector<8x128xf32>
    %349 = arith.select %347, %297, %271 : vector<8x128xf32>
    %c4_i32 = arith.constant 4 : i32
    %350 = arith.index_cast %c4_i32 : i32 to index
    %c0_99 = arith.constant 0 : index
    %c0_100 = arith.constant 0 : index
    %351 = vector.load %arg4[%350, %c0_99, %c0_100] : memref<8x8x128xf32, #tpu.memory_space<vmem>>, vector<1x8x128xf32>
    %352 = vector.shape_cast %351 : vector<1x8x128xf32> to vector<8x128xf32>
    %353 = arith.index_cast %c4_i32 : i32 to index
    %c0_101 = arith.constant 0 : index
    %c0_102 = arith.constant 0 : index
    %354 = vector.load %arg5[%353, %c0_101, %c0_102] : memref<8x8x128xf32, #tpu.memory_space<vmem>>, vector<1x8x128xf32>
    %355 = vector.shape_cast %354 : vector<1x8x128xf32> to vector<8x128xf32>
    %356 = tpu.reciprocal %348 {approx = true} : vector<8x128xf32> -> vector<8x128xf32>
    %357 = arith.mulf %348, %356 : vector<8x128xf32>
    %cst_103 = arith.constant 2.000000e+00 : f32
    %358 = vector.broadcast %cst_103 : f32 to vector<8x128xf32>
    %359 = arith.subf %358, %357 : vector<8x128xf32>
    %360 = arith.mulf %356, %359 : vector<8x128xf32>
    %361 = arith.mulf %352, %360 : vector<8x128xf32>
    %362 = math.exp %361 : vector<8x128xf32>
    %cst_104 = arith.constant 3.000000e+00 : f32
    %363 = vector.broadcast %cst_104 : f32 to vector<8x128xf32>
    %364 = arith.subf %355, %363 : vector<8x128xf32>
    %365 = vector.broadcast %4 : f32 to vector<8x128xf32>
    %366 = arith.mulf %365, %364 : vector<8x128xf32>
    %367 = arith.addf %349, %366 : vector<8x128xf32>
    %368 = vector.broadcast %15 : f32 to vector<8x128xf32>
    %369 = arith.mulf %368, %367 : vector<8x128xf32>
    %370 = vector.broadcast %14 : f32 to vector<8x128xf32>
    %371 = arith.addf %370, %369 : vector<8x128xf32>
    %cst_105 = arith.constant 1.000000e+00 : f32
    %cst_106 = arith.constant 1.000000e+01 : f32
    %372 = vector.broadcast %cst_105 : f32 to vector<8x128xf32>
    %373 = arith.maximumf %372, %371 : vector<8x128xf32>
    %374 = vector.broadcast %cst_106 : f32 to vector<8x128xf32>
    %375 = arith.minimumf %374, %373 : vector<8x128xf32>
    %376 = math.log %348 : vector<8x128xf32>
    %377 = math.log %375 : vector<8x128xf32>
    %cst_107 = arith.constant 1.000000e+00 : f32
    %378 = vector.broadcast %cst_107 : f32 to vector<8x128xf32>
    %379 = arith.subf %378, %362 : vector<8x128xf32>
    %cst_108 = arith.constant 1.100000e+01 : f32
    %380 = vector.broadcast %cst_108 : f32 to vector<8x128xf32>
    %381 = arith.subf %380, %375 : vector<8x128xf32>
    %382 = vector.broadcast %13 : f32 to vector<8x128xf32>
    %383 = arith.mulf %382, %381 : vector<8x128xf32>
    %384 = vector.broadcast %7 : f32 to vector<8x128xf32>
    %385 = arith.mulf %384, %376 : vector<8x128xf32>
    %386 = math.exp %385 : vector<8x128xf32>
    %387 = arith.mulf %383, %386 : vector<8x128xf32>
    %388 = vector.broadcast %8 : f32 to vector<8x128xf32>
    %389 = arith.mulf %379, %388 : vector<8x128xf32>
    %390 = math.exp %389 : vector<8x128xf32>
    %cst_109 = arith.constant 1.000000e+00 : f32
    %391 = vector.broadcast %cst_109 : f32 to vector<8x128xf32>
    %392 = arith.subf %390, %391 : vector<8x128xf32>
    %393 = arith.mulf %387, %392 : vector<8x128xf32>
    %cst_110 = arith.constant 1.000000e+00 : f32
    %394 = vector.broadcast %cst_110 : f32 to vector<8x128xf32>
    %395 = arith.addf %394, %393 : vector<8x128xf32>
    %396 = arith.mulf %348, %395 : vector<8x128xf32>
    %397 = vector.broadcast %10 : f32 to vector<8x128xf32>
    %398 = arith.mulf %397, %377 : vector<8x128xf32>
    %399 = vector.broadcast %11 : f32 to vector<8x128xf32>
    %400 = arith.mulf %399, %376 : vector<8x128xf32>
    %401 = arith.addf %398, %400 : vector<8x128xf32>
    %402 = vector.broadcast %12 : f32 to vector<8x128xf32>
    %403 = arith.mulf %379, %402 : vector<8x128xf32>
    %404 = arith.addf %401, %403 : vector<8x128xf32>
    %405 = math.exp %404 : vector<8x128xf32>
    %406 = vector.broadcast %9 : f32 to vector<8x128xf32>
    %407 = arith.mulf %406, %405 : vector<8x128xf32>
    %cst_111 = arith.constant 1.000000e+00 : f32
    %408 = vector.broadcast %cst_111 : f32 to vector<8x128xf32>
    %409 = arith.cmpf ogt, %355, %408 : vector<8x128xf32>
    %410 = arith.select %409, %396, %407 : vector<8x128xi1>, vector<8x128xf32>
    %cst_112 = arith.constant 1.000000e-01 : f32
    %cst_113 = arith.constant 3.650000e+04 : f32
    %411 = vector.broadcast %cst_112 : f32 to vector<8x128xf32>
    %412 = arith.maximumf %411, %410 : vector<8x128xf32>
    %413 = vector.broadcast %cst_113 : f32 to vector<8x128xf32>
    %414 = arith.minimumf %413, %412 : vector<8x128xf32>
    %415 = arith.index_cast %c4_i32 : i32 to index
    %c0_114 = arith.constant 0 : index
    %c0_115 = arith.constant 0 : index
    %416 = vector.load %arg8[%415, %c0_114, %c0_115] : memref<8x8x128xf32, #tpu.memory_space<vmem>>, vector<1x8x128xf32>
    %417 = vector.shape_cast %416 : vector<1x8x128xf32> to vector<8x128xf32>
    %418 = vector.shape_cast %414 : vector<8x128xf32> to vector<1x8x128xf32>
    tpu.vector_store %arg8[%415, %c0_114, %c0_115], %418 {strides = array<i32>} : memref<8x8x128xf32, #tpu.memory_space<vmem>>, vector<1x8x128xf32>,
    %419 = arith.index_cast %c4_i32 : i32 to index
    %c0_116 = arith.constant 0 : index
    %c0_117 = arith.constant 0 : index
    %420 = vector.load %arg9[%419, %c0_116, %c0_117] : memref<8x8x128xf32, #tpu.memory_space<vmem>>, vector<1x8x128xf32>
    %421 = vector.shape_cast %420 : vector<1x8x128xf32> to vector<8x128xf32>
    %422 = vector.shape_cast %375 : vector<8x128xf32> to vector<1x8x128xf32>
    tpu.vector_store %arg9[%419, %c0_116, %c0_117], %422 {strides = array<i32>} : memref<8x8x128xf32, #tpu.memory_space<vmem>>, vector<1x8x128xf32>,
    %c8_i32_118 = arith.constant 8 : i32
    %423 = arith.muli %arg1, %c8_i32_118 : i32
    %424 = arith.addi %423, %c4_i32 : i32
    %c8_i32_119 = arith.constant 8 : i32
    %425 = arith.cmpi slt, %424, %c8_i32_119 : i32
    %426 = arith.select %425, %414, %348 : vector<8x128xf32>
    %427 = arith.select %425, %375, %349 : vector<8x128xf32>
    %c5_i32 = arith.constant 5 : i32
    %428 = arith.index_cast %c5_i32 : i32 to index
    %c0_120 = arith.constant 0 : index
    %c0_121 = arith.constant 0 : index
    %429 = vector.load %arg4[%428, %c0_120, %c0_121] : memref<8x8x128xf32, #tpu.memory_space<vmem>>, vector<1x8x128xf32>
    %430 = vector.shape_cast %429 : vector<1x8x128xf32> to vector<8x128xf32>
    %431 = arith.index_cast %c5_i32 : i32 to index
    %c0_122 = arith.constant 0 : index
    %c0_123 = arith.constant 0 : index
    %432 = vector.load %arg5[%431, %c0_122, %c0_123] : memref<8x8x128xf32, #tpu.memory_space<vmem>>, vector<1x8x128xf32>
    %433 = vector.shape_cast %432 : vector<1x8x128xf32> to vector<8x128xf32>
    %434 = tpu.reciprocal %426 {approx = true} : vector<8x128xf32> -> vector<8x128xf32>
    %435 = arith.mulf %426, %434 : vector<8x128xf32>
    %cst_124 = arith.constant 2.000000e+00 : f32
    %436 = vector.broadcast %cst_124 : f32 to vector<8x128xf32>
    %437 = arith.subf %436, %435 : vector<8x128xf32>
    %438 = arith.mulf %434, %437 : vector<8x128xf32>
    %439 = arith.mulf %430, %438 : vector<8x128xf32>
    %440 = math.exp %439 : vector<8x128xf32>
    %cst_125 = arith.constant 3.000000e+00 : f32
    %441 = vector.broadcast %cst_125 : f32 to vector<8x128xf32>
    %442 = arith.subf %433, %441 : vector<8x128xf32>
    %443 = vector.broadcast %4 : f32 to vector<8x128xf32>
    %444 = arith.mulf %443, %442 : vector<8x128xf32>
    %445 = arith.addf %427, %444 : vector<8x128xf32>
    %446 = vector.broadcast %15 : f32 to vector<8x128xf32>
    %447 = arith.mulf %446, %445 : vector<8x128xf32>
    %448 = vector.broadcast %14 : f32 to vector<8x128xf32>
    %449 = arith.addf %448, %447 : vector<8x128xf32>
    %cst_126 = arith.constant 1.000000e+00 : f32
    %cst_127 = arith.constant 1.000000e+01 : f32
    %450 = vector.broadcast %cst_126 : f32 to vector<8x128xf32>
    %451 = arith.maximumf %450, %449 : vector<8x128xf32>
    %452 = vector.broadcast %cst_127 : f32 to vector<8x128xf32>
    %453 = arith.minimumf %452, %451 : vector<8x128xf32>
    %454 = math.log %426 : vector<8x128xf32>
    %455 = math.log %453 : vector<8x128xf32>
    %cst_128 = arith.constant 1.000000e+00 : f32
    %456 = vector.broadcast %cst_128 : f32 to vector<8x128xf32>
    %457 = arith.subf %456, %440 : vector<8x128xf32>
    %cst_129 = arith.constant 1.100000e+01 : f32
    %458 = vector.broadcast %cst_129 : f32 to vector<8x128xf32>
    %459 = arith.subf %458, %453 : vector<8x128xf32>
    %460 = vector.broadcast %13 : f32 to vector<8x128xf32>
    %461 = arith.mulf %460, %459 : vector<8x128xf32>
    %462 = vector.broadcast %7 : f32 to vector<8x128xf32>
    %463 = arith.mulf %462, %454 : vector<8x128xf32>
    %464 = math.exp %463 : vector<8x128xf32>
    %465 = arith.mulf %461, %464 : vector<8x128xf32>
    %466 = vector.broadcast %8 : f32 to vector<8x128xf32>
    %467 = arith.mulf %457, %466 : vector<8x128xf32>
    %468 = math.exp %467 : vector<8x128xf32>
    %cst_130 = arith.constant 1.000000e+00 : f32
    %469 = vector.broadcast %cst_130 : f32 to vector<8x128xf32>
    %470 = arith.subf %468, %469 : vector<8x128xf32>
    %471 = arith.mulf %465, %470 : vector<8x128xf32>
    %cst_131 = arith.constant 1.000000e+00 : f32
    %472 = vector.broadcast %cst_131 : f32 to vector<8x128xf32>
    %473 = arith.addf %472, %471 : vector<8x128xf32>
    %474 = arith.mulf %426, %473 : vector<8x128xf32>
    %475 = vector.broadcast %10 : f32 to vector<8x128xf32>
    %476 = arith.mulf %475, %455 : vector<8x128xf32>
    %477 = vector.broadcast %11 : f32 to vector<8x128xf32>
    %478 = arith.mulf %477, %454 : vector<8x128xf32>
    %479 = arith.addf %476, %478 : vector<8x128xf32>
    %480 = vector.broadcast %12 : f32 to vector<8x128xf32>
    %481 = arith.mulf %457, %480 : vector<8x128xf32>
    %482 = arith.addf %479, %481 : vector<8x128xf32>
    %483 = math.exp %482 : vector<8x128xf32>
    %484 = vector.broadcast %9 : f32 to vector<8x128xf32>
    %485 = arith.mulf %484, %483 : vector<8x128xf32>
    %cst_132 = arith.constant 1.000000e+00 : f32
    %486 = vector.broadcast %cst_132 : f32 to vector<8x128xf32>
    %487 = arith.cmpf ogt, %433, %486 : vector<8x128xf32>
    %488 = arith.select %487, %474, %485 : vector<8x128xi1>, vector<8x128xf32>
    %cst_133 = arith.constant 1.000000e-01 : f32
    %cst_134 = arith.constant 3.650000e+04 : f32
    %489 = vector.broadcast %cst_133 : f32 to vector<8x128xf32>
    %490 = arith.maximumf %489, %488 : vector<8x128xf32>
    %491 = vector.broadcast %cst_134 : f32 to vector<8x128xf32>
    %492 = arith.minimumf %491, %490 : vector<8x128xf32>
    %493 = arith.index_cast %c5_i32 : i32 to index
    %c0_135 = arith.constant 0 : index
    %c0_136 = arith.constant 0 : index
    %494 = vector.load %arg8[%493, %c0_135, %c0_136] : memref<8x8x128xf32, #tpu.memory_space<vmem>>, vector<1x8x128xf32>
    %495 = vector.shape_cast %494 : vector<1x8x128xf32> to vector<8x128xf32>
    %496 = vector.shape_cast %492 : vector<8x128xf32> to vector<1x8x128xf32>
    tpu.vector_store %arg8[%493, %c0_135, %c0_136], %496 {strides = array<i32>} : memref<8x8x128xf32, #tpu.memory_space<vmem>>, vector<1x8x128xf32>,
    %497 = arith.index_cast %c5_i32 : i32 to index
    %c0_137 = arith.constant 0 : index
    %c0_138 = arith.constant 0 : index
    %498 = vector.load %arg9[%497, %c0_137, %c0_138] : memref<8x8x128xf32, #tpu.memory_space<vmem>>, vector<1x8x128xf32>
    %499 = vector.shape_cast %498 : vector<1x8x128xf32> to vector<8x128xf32>
    %500 = vector.shape_cast %453 : vector<8x128xf32> to vector<1x8x128xf32>
    tpu.vector_store %arg9[%497, %c0_137, %c0_138], %500 {strides = array<i32>} : memref<8x8x128xf32, #tpu.memory_space<vmem>>, vector<1x8x128xf32>,
    %c8_i32_139 = arith.constant 8 : i32
    %501 = arith.muli %arg1, %c8_i32_139 : i32
    %502 = arith.addi %501, %c5_i32 : i32
    %c8_i32_140 = arith.constant 8 : i32
    %503 = arith.cmpi slt, %502, %c8_i32_140 : i32
    %504 = arith.select %503, %492, %426 : vector<8x128xf32>
    %505 = arith.select %503, %453, %427 : vector<8x128xf32>
    %c6_i32 = arith.constant 6 : i32
    %506 = arith.index_cast %c6_i32 : i32 to index
    %c0_141 = arith.constant 0 : index
    %c0_142 = arith.constant 0 : index
    %507 = vector.load %arg4[%506, %c0_141, %c0_142] : memref<8x8x128xf32, #tpu.memory_space<vmem>>, vector<1x8x128xf32>
    %508 = vector.shape_cast %507 : vector<1x8x128xf32> to vector<8x128xf32>
    %509 = arith.index_cast %c6_i32 : i32 to index
    %c0_143 = arith.constant 0 : index
    %c0_144 = arith.constant 0 : index
    %510 = vector.load %arg5[%509, %c0_143, %c0_144] : memref<8x8x128xf32, #tpu.memory_space<vmem>>, vector<1x8x128xf32>
    %511 = vector.shape_cast %510 : vector<1x8x128xf32> to vector<8x128xf32>
    %512 = tpu.reciprocal %504 {approx = true} : vector<8x128xf32> -> vector<8x128xf32>
    %513 = arith.mulf %504, %512 : vector<8x128xf32>
    %cst_145 = arith.constant 2.000000e+00 : f32
    %514 = vector.broadcast %cst_145 : f32 to vector<8x128xf32>
    %515 = arith.subf %514, %513 : vector<8x128xf32>
    %516 = arith.mulf %512, %515 : vector<8x128xf32>
    %517 = arith.mulf %508, %516 : vector<8x128xf32>
    %518 = math.exp %517 : vector<8x128xf32>
    %cst_146 = arith.constant 3.000000e+00 : f32
    %519 = vector.broadcast %cst_146 : f32 to vector<8x128xf32>
    %520 = arith.subf %511, %519 : vector<8x128xf32>
    %521 = vector.broadcast %4 : f32 to vector<8x128xf32>
    %522 = arith.mulf %521, %520 : vector<8x128xf32>
    %523 = arith.addf %505, %522 : vector<8x128xf32>
    %524 = vector.broadcast %15 : f32 to vector<8x128xf32>
    %525 = arith.mulf %524, %523 : vector<8x128xf32>
    %526 = vector.broadcast %14 : f32 to vector<8x128xf32>
    %527 = arith.addf %526, %525 : vector<8x128xf32>
    %cst_147 = arith.constant 1.000000e+00 : f32
    %cst_148 = arith.constant 1.000000e+01 : f32
    %528 = vector.broadcast %cst_147 : f32 to vector<8x128xf32>
    %529 = arith.maximumf %528, %527 : vector<8x128xf32>
    %530 = vector.broadcast %cst_148 : f32 to vector<8x128xf32>
    %531 = arith.minimumf %530, %529 : vector<8x128xf32>
    %532 = math.log %504 : vector<8x128xf32>
    %533 = math.log %531 : vector<8x128xf32>
    %cst_149 = arith.constant 1.000000e+00 : f32
    %534 = vector.broadcast %cst_149 : f32 to vector<8x128xf32>
    %535 = arith.subf %534, %518 : vector<8x128xf32>
    %cst_150 = arith.constant 1.100000e+01 : f32
    %536 = vector.broadcast %cst_150 : f32 to vector<8x128xf32>
    %537 = arith.subf %536, %531 : vector<8x128xf32>
    %538 = vector.broadcast %13 : f32 to vector<8x128xf32>
    %539 = arith.mulf %538, %537 : vector<8x128xf32>
    %540 = vector.broadcast %7 : f32 to vector<8x128xf32>
    %541 = arith.mulf %540, %532 : vector<8x128xf32>
    %542 = math.exp %541 : vector<8x128xf32>
    %543 = arith.mulf %539, %542 : vector<8x128xf32>
    %544 = vector.broadcast %8 : f32 to vector<8x128xf32>
    %545 = arith.mulf %535, %544 : vector<8x128xf32>
    %546 = math.exp %545 : vector<8x128xf32>
    %cst_151 = arith.constant 1.000000e+00 : f32
    %547 = vector.broadcast %cst_151 : f32 to vector<8x128xf32>
    %548 = arith.subf %546, %547 : vector<8x128xf32>
    %549 = arith.mulf %543, %548 : vector<8x128xf32>
    %cst_152 = arith.constant 1.000000e+00 : f32
    %550 = vector.broadcast %cst_152 : f32 to vector<8x128xf32>
    %551 = arith.addf %550, %549 : vector<8x128xf32>
    %552 = arith.mulf %504, %551 : vector<8x128xf32>
    %553 = vector.broadcast %10 : f32 to vector<8x128xf32>
    %554 = arith.mulf %553, %533 : vector<8x128xf32>
    %555 = vector.broadcast %11 : f32 to vector<8x128xf32>
    %556 = arith.mulf %555, %532 : vector<8x128xf32>
    %557 = arith.addf %554, %556 : vector<8x128xf32>
    %558 = vector.broadcast %12 : f32 to vector<8x128xf32>
    %559 = arith.mulf %535, %558 : vector<8x128xf32>
    %560 = arith.addf %557, %559 : vector<8x128xf32>
    %561 = math.exp %560 : vector<8x128xf32>
    %562 = vector.broadcast %9 : f32 to vector<8x128xf32>
    %563 = arith.mulf %562, %561 : vector<8x128xf32>
    %cst_153 = arith.constant 1.000000e+00 : f32
    %564 = vector.broadcast %cst_153 : f32 to vector<8x128xf32>
    %565 = arith.cmpf ogt, %511, %564 : vector<8x128xf32>
    %566 = arith.select %565, %552, %563 : vector<8x128xi1>, vector<8x128xf32>
    %cst_154 = arith.constant 1.000000e-01 : f32
    %cst_155 = arith.constant 3.650000e+04 : f32
    %567 = vector.broadcast %cst_154 : f32 to vector<8x128xf32>
    %568 = arith.maximumf %567, %566 : vector<8x128xf32>
    %569 = vector.broadcast %cst_155 : f32 to vector<8x128xf32>
    %570 = arith.minimumf %569, %568 : vector<8x128xf32>
    %571 = arith.index_cast %c6_i32 : i32 to index
    %c0_156 = arith.constant 0 : index
    %c0_157 = arith.constant 0 : index
    %572 = vector.load %arg8[%571, %c0_156, %c0_157] : memref<8x8x128xf32, #tpu.memory_space<vmem>>, vector<1x8x128xf32>
    %573 = vector.shape_cast %572 : vector<1x8x128xf32> to vector<8x128xf32>
    %574 = vector.shape_cast %570 : vector<8x128xf32> to vector<1x8x128xf32>
    tpu.vector_store %arg8[%571, %c0_156, %c0_157], %574 {strides = array<i32>} : memref<8x8x128xf32, #tpu.memory_space<vmem>>, vector<1x8x128xf32>,
    %575 = arith.index_cast %c6_i32 : i32 to index
    %c0_158 = arith.constant 0 : index
    %c0_159 = arith.constant 0 : index
    %576 = vector.load %arg9[%575, %c0_158, %c0_159] : memref<8x8x128xf32, #tpu.memory_space<vmem>>, vector<1x8x128xf32>
    %577 = vector.shape_cast %576 : vector<1x8x128xf32> to vector<8x128xf32>
    %578 = vector.shape_cast %531 : vector<8x128xf32> to vector<1x8x128xf32>
    tpu.vector_store %arg9[%575, %c0_158, %c0_159], %578 {strides = array<i32>} : memref<8x8x128xf32, #tpu.memory_space<vmem>>, vector<1x8x128xf32>,
    %c8_i32_160 = arith.constant 8 : i32
    %579 = arith.muli %arg1, %c8_i32_160 : i32
    %580 = arith.addi %579, %c6_i32 : i32
    %c8_i32_161 = arith.constant 8 : i32
    %581 = arith.cmpi slt, %580, %c8_i32_161 : i32
    %582 = arith.select %581, %570, %504 : vector<8x128xf32>
    %583 = arith.select %581, %531, %505 : vector<8x128xf32>
    %c7_i32 = arith.constant 7 : i32
    %584 = arith.index_cast %c7_i32 : i32 to index
    %c0_162 = arith.constant 0 : index
    %c0_163 = arith.constant 0 : index
    %585 = vector.load %arg4[%584, %c0_162, %c0_163] : memref<8x8x128xf32, #tpu.memory_space<vmem>>, vector<1x8x128xf32>
    %586 = vector.shape_cast %585 : vector<1x8x128xf32> to vector<8x128xf32>
    %587 = arith.index_cast %c7_i32 : i32 to index
    %c0_164 = arith.constant 0 : index
    %c0_165 = arith.constant 0 : index
    %588 = vector.load %arg5[%587, %c0_164, %c0_165] : memref<8x8x128xf32, #tpu.memory_space<vmem>>, vector<1x8x128xf32>
    %589 = vector.shape_cast %588 : vector<1x8x128xf32> to vector<8x128xf32>
    %590 = tpu.reciprocal %582 {approx = true} : vector<8x128xf32> -> vector<8x128xf32>
    %591 = arith.mulf %582, %590 : vector<8x128xf32>
    %cst_166 = arith.constant 2.000000e+00 : f32
    %592 = vector.broadcast %cst_166 : f32 to vector<8x128xf32>
    %593 = arith.subf %592, %591 : vector<8x128xf32>
    %594 = arith.mulf %590, %593 : vector<8x128xf32>
    %595 = arith.mulf %586, %594 : vector<8x128xf32>
    %596 = math.exp %595 : vector<8x128xf32>
    %cst_167 = arith.constant 3.000000e+00 : f32
    %597 = vector.broadcast %cst_167 : f32 to vector<8x128xf32>
    %598 = arith.subf %589, %597 : vector<8x128xf32>
    %599 = vector.broadcast %4 : f32 to vector<8x128xf32>
    %600 = arith.mulf %599, %598 : vector<8x128xf32>
    %601 = arith.addf %583, %600 : vector<8x128xf32>
    %602 = vector.broadcast %15 : f32 to vector<8x128xf32>
    %603 = arith.mulf %602, %601 : vector<8x128xf32>
    %604 = vector.broadcast %14 : f32 to vector<8x128xf32>
    %605 = arith.addf %604, %603 : vector<8x128xf32>
    %cst_168 = arith.constant 1.000000e+00 : f32
    %cst_169 = arith.constant 1.000000e+01 : f32
    %606 = vector.broadcast %cst_168 : f32 to vector<8x128xf32>
    %607 = arith.maximumf %606, %605 : vector<8x128xf32>
    %608 = vector.broadcast %cst_169 : f32 to vector<8x128xf32>
    %609 = arith.minimumf %608, %607 : vector<8x128xf32>
    %610 = math.log %582 : vector<8x128xf32>
    %611 = math.log %609 : vector<8x128xf32>
    %cst_170 = arith.constant 1.000000e+00 : f32
    %612 = vector.broadcast %cst_170 : f32 to vector<8x128xf32>
    %613 = arith.subf %612, %596 : vector<8x128xf32>
    %cst_171 = arith.constant 1.100000e+01 : f32
    %614 = vector.broadcast %cst_171 : f32 to vector<8x128xf32>
    %615 = arith.subf %614, %609 : vector<8x128xf32>
    %616 = vector.broadcast %13 : f32 to vector<8x128xf32>
    %617 = arith.mulf %616, %615 : vector<8x128xf32>
    %618 = vector.broadcast %7 : f32 to vector<8x128xf32>
    %619 = arith.mulf %618, %610 : vector<8x128xf32>
    %620 = math.exp %619 : vector<8x128xf32>
    %621 = arith.mulf %617, %620 : vector<8x128xf32>
    %622 = vector.broadcast %8 : f32 to vector<8x128xf32>
    %623 = arith.mulf %613, %622 : vector<8x128xf32>
    %624 = math.exp %623 : vector<8x128xf32>
    %cst_172 = arith.constant 1.000000e+00 : f32
    %625 = vector.broadcast %cst_172 : f32 to vector<8x128xf32>
    %626 = arith.subf %624, %625 : vector<8x128xf32>
    %627 = arith.mulf %621, %626 : vector<8x128xf32>
    %cst_173 = arith.constant 1.000000e+00 : f32
    %628 = vector.broadcast %cst_173 : f32 to vector<8x128xf32>
    %629 = arith.addf %628, %627 : vector<8x128xf32>
    %630 = arith.mulf %582, %629 : vector<8x128xf32>
    %631 = vector.broadcast %10 : f32 to vector<8x128xf32>
    %632 = arith.mulf %631, %611 : vector<8x128xf32>
    %633 = vector.broadcast %11 : f32 to vector<8x128xf32>
    %634 = arith.mulf %633, %610 : vector<8x128xf32>
    %635 = arith.addf %632, %634 : vector<8x128xf32>
    %636 = vector.broadcast %12 : f32 to vector<8x128xf32>
    %637 = arith.mulf %613, %636 : vector<8x128xf32>
    %638 = arith.addf %635, %637 : vector<8x128xf32>
    %639 = math.exp %638 : vector<8x128xf32>
    %640 = vector.broadcast %9 : f32 to vector<8x128xf32>
    %641 = arith.mulf %640, %639 : vector<8x128xf32>
    %cst_174 = arith.constant 1.000000e+00 : f32
    %642 = vector.broadcast %cst_174 : f32 to vector<8x128xf32>
    %643 = arith.cmpf ogt, %589, %642 : vector<8x128xf32>
    %644 = arith.select %643, %630, %641 : vector<8x128xi1>, vector<8x128xf32>
    %cst_175 = arith.constant 1.000000e-01 : f32
    %cst_176 = arith.constant 3.650000e+04 : f32
    %645 = vector.broadcast %cst_175 : f32 to vector<8x128xf32>
    %646 = arith.maximumf %645, %644 : vector<8x128xf32>
    %647 = vector.broadcast %cst_176 : f32 to vector<8x128xf32>
    %648 = arith.minimumf %647, %646 : vector<8x128xf32>
    %649 = arith.index_cast %c7_i32 : i32 to index
    %c0_177 = arith.constant 0 : index
    %c0_178 = arith.constant 0 : index
    %650 = vector.load %arg8[%649, %c0_177, %c0_178] : memref<8x8x128xf32, #tpu.memory_space<vmem>>, vector<1x8x128xf32>
    %651 = vector.shape_cast %650 : vector<1x8x128xf32> to vector<8x128xf32>
    %652 = vector.shape_cast %648 : vector<8x128xf32> to vector<1x8x128xf32>
    tpu.vector_store %arg8[%649, %c0_177, %c0_178], %652 {strides = array<i32>} : memref<8x8x128xf32, #tpu.memory_space<vmem>>, vector<1x8x128xf32>,
    %653 = arith.index_cast %c7_i32 : i32 to index
    %c0_179 = arith.constant 0 : index
    %c0_180 = arith.constant 0 : index
    %654 = vector.load %arg9[%653, %c0_179, %c0_180] : memref<8x8x128xf32, #tpu.memory_space<vmem>>, vector<1x8x128xf32>
    %655 = vector.shape_cast %654 : vector<1x8x128xf32> to vector<8x128xf32>
    %656 = vector.shape_cast %609 : vector<8x128xf32> to vector<1x8x128xf32>
    tpu.vector_store %arg9[%653, %c0_179, %c0_180], %656 {strides = array<i32>} : memref<8x8x128xf32, #tpu.memory_space<vmem>>, vector<1x8x128xf32>,
    %c8_i32_181 = arith.constant 8 : i32
    %657 = arith.muli %arg1, %c8_i32_181 : i32
    %658 = arith.addi %657, %c7_i32 : i32
    %c8_i32_182 = arith.constant 8 : i32
    %659 = arith.cmpi slt, %658, %c8_i32_182 : i32
    %660 = arith.select %659, %648, %582 : vector<8x128xf32>
    %661 = arith.select %659, %609, %583 : vector<8x128xf32>
    %c7_i32_183 = arith.constant 7 : i32
    %c0_184 = arith.constant 0 : index
    %c0_185 = arith.constant 0 : index
    %662 = vector.load %arg12[%c0_184, %c0_185] : memref<8x128xf32, #tpu.memory_space<vmem>>, vector<8x128xf32>
    tpu.vector_store %arg12[%c0_184, %c0_185], %660 {strides = array<i32>} : memref<8x128xf32, #tpu.memory_space<vmem>>, vector<8x128xf32>,
    %c0_186 = arith.constant 0 : index
    %c0_187 = arith.constant 0 : index
    %663 = vector.load %arg13[%c0_186, %c0_187] : memref<8x128xf32, #tpu.memory_space<vmem>>, vector<8x128xf32>
    tpu.vector_store %arg13[%c0_186, %c0_187], %661 {strides = array<i32>} : memref<8x128xf32, #tpu.memory_space<vmem>>, vector<8x128xf32>,
    %c0_188 = arith.constant 0 : index
    %c0_189 = arith.constant 0 : index
    %664 = vector.load %arg10[%c0_188, %c0_189] : memref<8x128xf32, #tpu.memory_space<vmem>>, vector<8x128xf32>
    tpu.vector_store %arg10[%c0_188, %c0_189], %660 {strides = array<i32>} : memref<8x128xf32, #tpu.memory_space<vmem>>, vector<8x128xf32>,
    %c0_190 = arith.constant 0 : index
    %c0_191 = arith.constant 0 : index
    %665 = vector.load %arg11[%c0_190, %c0_191] : memref<8x128xf32, #tpu.memory_space<vmem>>, vector<8x128xf32>
    tpu.vector_store %arg11[%c0_190, %c0_191], %661 {strides = array<i32>} : memref<8x128xf32, #tpu.memory_space<vmem>>, vector<8x128xf32>,
    return
  }
  func.func @transform_0(%arg0: i32, %arg1: i32) -> i32 {
    %c0_i32 = arith.constant 0 : i32
    %c0_i32_0 = arith.constant 0 : i32
    return %c0_i32 : i32
  }
  func.func @transform_1(%arg0: i32, %arg1: i32) -> i32 {
    %c0_i32 = arith.constant 0 : i32
    %c0_i32_0 = arith.constant 0 : i32
    return %c0_i32 : i32
  }
  func.func @transform_2(%arg0: i32, %arg1: i32) -> (i32, i32, i32) {
    %c0_i32 = arith.constant 0 : i32
    %c0_i32_0 = arith.constant 0 : i32
    return %arg1, %arg0, %c0_i32 : i32, i32, i32
  }
  func.func @transform_3(%arg0: i32, %arg1: i32) -> (i32, i32, i32) {
    %c0_i32 = arith.constant 0 : i32
    %c0_i32_0 = arith.constant 0 : i32
    return %arg1, %arg0, %c0_i32 : i32, i32, i32
  }
  func.func @transform_4(%arg0: i32, %arg1: i32) -> (i32, i32) {
    %c0_i32 = arith.constant 0 : i32
    %c0_i32_0 = arith.constant 0 : i32
    return %arg0, %c0_i32 : i32, i32
  }
  func.func @transform_5(%arg0: i32, %arg1: i32) -> (i32, i32) {
    %c0_i32 = arith.constant 0 : i32
    %c0_i32_0 = arith.constant 0 : i32
    return %arg0, %c0_i32 : i32, i32
  }
  func.func @transform_6(%arg0: i32, %arg1: i32) -> (i32, i32, i32) {
    %c0_i32 = arith.constant 0 : i32
    %c0_i32_0 = arith.constant 0 : i32
    return %arg1, %arg0, %c0_i32 : i32, i32, i32
  }
  func.func @transform_7(%arg0: i32, %arg1: i32) -> (i32, i32, i32) {
    %c0_i32 = arith.constant 0 : i32
    %c0_i32_0 = arith.constant 0 : i32
    return %arg1, %arg0, %c0_i32 : i32, i32, i32
  }
  func.func @transform_8(%arg0: i32, %arg1: i32) -> (i32, i32) {
    %c0_i32 = arith.constant 0 : i32
    %c0_i32_0 = arith.constant 0 : i32
    return %arg0, %c0_i32 : i32, i32
  }
  func.func @transform_9(%arg0: i32, %arg1: i32) -> (i32, i32) {
    %c0_i32 = arith.constant 0 : i32
    %c0_i32_0 = arith.constant 0 : i32
    return %arg0, %c0_i32 : i32, i32
  }
}

</mosaic_0001>

<bundles_post_ra>
// kernel: tpu_custom_call.1
= control target key start
LH: loop header
LB: loop body
LE: loop exit
PB: predicated region body
PF: predicated region fallthrough
CT: control target
= control target key end

     0   :  { %16 = vsyncpa [#allocation8], 0  ;;  %s1380_s0 = inlined_call_operand.<no memory space> [shape: s32[1], index: 0, kind: input, shape index: {}]   ;;  %s1381_s1 = inlined_call_operand.vmem [shape: f32[13], index: 1, kind: input, shape index: {}]   ;;  %s1382_s2 = inlined_call_operand.hbm [shape: f32[8,8,128], index: 2, kind: input, shape index: {}]   ;;  %s1383_s3 = inlined_call_operand.hbm [shape: f32[8,8,128], index: 3, kind: input, shape index: {}]   ;;  %s1384_s4 = inlined_call_operand.hbm [shape: f32[8,128], index: 4, kind: input, shape index: {}]   ;;  %s1385_s5 = inlined_call_operand.hbm [shape: f32[8,128], index: 5, kind: input, shape index: {}]   ;;  %s1386_s6 = inlined_call_operand.hbm [shape: f32[8,8,128], index: 6, kind: output, shape index: {0}]   ;;  %s1387_s7 = inlined_call_operand.hbm [shape: f32[8,8,128], index: 7, kind: output, shape index: {1}]   ;;  %s1388_s8 = inlined_call_operand.hbm [shape: f32[8,128], index: 8, kind: output, shape index: {2}]   ;;  %s1389_s9 = inlined_call_operand.hbm [shape: f32[8,128], index: 9, kind: output, shape index: {3}]  }
   0x1   :  { %17 = vsyncpa [#allocation6], 0 }
   0x2   :  { %18 = vsyncpa [#allocation11], 0 }
   0x3   :  { %19 = vsyncpa [#allocation14], 0 }
   0x4   :  { %20 = vsyncpa [#allocation7], 0 }
   0x5   :  { %21 = vsyncpa [#allocation17], 0 }
   0x6   :  { %22 = vsyncpa [#allocation20], 0  ;;  %s51_s11 = sshll.u32 %s1383_s3, 4  ;;  %s1077_s12 = smov [#allocation10]   ;;  %s52_s11 = int_to_ptr.hbm [resolvable:$true] %s51_s11 }
   0x7   :  { %s53_s13 = sshll.u32 %s1077_s12, 4  ;;  %s30_s16 = sshll.u32 %s1381_s1, 4  ;;  %s54_s13 = int_to_ptr.vmem [resolvable:$true] %s53_s13  ;;  %s31_s16 = int_to_ptr.vmem [resolvable:$true] %s30_s16 }
   0x8   :  { %s1078_s17 = smov 128   ;;  %s1079_s18 = smov 8  }
   0x9   :  { %59 = dma.hbm_to_vmem [thread:$0]  %s52_s11, 1024, %s54_s13, [#allocation11], %s1078_s17, %s1078_s17, %s1079_s18  }
   0xa   :  { %s1080_s19 = smov [#allocation5]   ;;  %s38_s3 = sshll.u32 %s1382_s2, 4  ;;  %s39_s3 = int_to_ptr.hbm [resolvable:$true] %s38_s3 }
   0xb   :  { %33 = dma.vmem_to_smem %s31_s16, 16, %s1080_s19, [#allocation8]  }
   0xc   :  { %s1081_s22 = smov [#allocation9]   ;;  %s65_s1 = sshll.u32 %s1384_s4, 4  ;;  %s66_s1 = int_to_ptr.hbm [resolvable:$true] %s65_s1 }
   0xd   :  { %s40_s23 = sshll.u32 %s1081_s22, 4  ;;  %s1082_s26 = smov [#allocation12]   ;;  %s41_s23 = int_to_ptr.vmem [resolvable:$true] %s40_s23 }
   0xe   :  { %46 = dma.hbm_to_vmem [thread:$0]  %s39_s3, 1024, %s41_s23, [#allocation6], %s1078_s17, %s1078_s17, %s1079_s18  }
   0xf   :  { %s67_s27 = sshll.u32 %s1082_s26, 4  ;;  %s76_s30 = sshll.u32 %s1385_s5, 4  ;;  %s68_s27 = int_to_ptr.vmem [resolvable:$true] %s67_s27  ;;  %s77_s30 = int_to_ptr.hbm [resolvable:$true] %s76_s30 }
  0x10   :  { %70 = dma.hbm_to_vmem [thread:$0]  %s66_s1, 128, %s68_s27, [#allocation11]  }
  0x11   :  { %s1083_s2 = smov [#allocation13]  }
  0x12   :  { %s78_s10 = sshll.u32 %s1083_s2, 4  ;;  %s79_s10 = int_to_ptr.vmem [resolvable:$true] %s78_s10 }
  0x13   :  { %81 = dma.hbm_to_vmem [thread:$0]  %s77_s30, 128, %s79_s10, [#allocation14]  }
  0x14   :  { %1063 = dma.done.wait [#allocation8], 16  }
  0x15   :  { %1064 = vsyncadd [#allocation8], 4294967280 }
  0x16   :  { %1065 = dma.done.wait [#allocation6], 1024  }
  0x17   :  { %1066 = vsyncadd [#allocation6], 4294966272 }
  0x18   :  { %1067 = dma.done.wait [#allocation11], 1152  }
  0x19   :  { %1068 = vsyncadd [#allocation11], 4294966144 }
  0x1a   :  { %1069 = dma.done.wait [#allocation14], 128  }
  0x1b   :  { %1070 = vsyncadd [#allocation14], 4294967168 }
  0x1c   :  { %102 = sfence }
  0x1d   :  { %s702_s4 = sld [smem:[#allocation5 + $0x2]]  ;;  %v1159_v0 = vld [vmem:[#allocation10] sm:$0xff]  ;;  %p123_p0 = scmp.ne.s32.totalorder %s1380_s0, 0  ;;  %v130_v4 = vld [vmem:[#allocation13] sm:$0xff]  ;;  %v1191_v30 = vld [vmem:[#allocation10 + $0x10] sm:$0xff] }
  0x1e   :  { %s703_s11 = sld [smem:[#allocation5 + $0x3]]  ;;  %v713_v1 = vadd.f32 -3.0, %v1159_v0  ;;  %v1167_v7 = vld [vmem:[#allocation12] sm:$0xff]  ;;  %v1171_v13 = vld [vmem:[#allocation10 + $0x8] sm:$0xff]  ;;  %v719_v34 = vadd.f32 -3.0, %v1191_v30  ;;  %v1199_v41 = vld [vmem:[#allocation10 + $0x18] sm:$0xff] }
  0x1f   :  { %s704_s12 = sld [smem:[#allocation5 + $0x4]]  ;;  %745 = vrcp.f32 %v1167_v7  ;;  %v717_v18 = vadd.f32 -3.0, %v1171_v13  ;;  %v132_v39 = vld [vmem:[#allocation9] sm:$0xff]  ;;  %v721_v45 = vadd.f32 -3.0, %v1199_v41  ;;  %vm186_vm1 = vcmp.gt.f32.partialorder %v1159_v0, 1.0  ;;  %s1084_s27 = smov [#allocation16]  }
  0x20   :  { %s705_s5 = sld [smem:[#allocation5 + $0x5]]  ;;  %v1210_v51 = vld [vmem:[#allocation10 + $0x20] sm:$0xff]  ;;  %s647_s28 = sshll.u32 %s1084_s27, 4  ;;  %vm256_vm2 = vcmp.gt.f32.partialorder %v1171_v13, 1.0  ;;  %vm316_vm3 = vcmp.gt.f32.partialorder %v1191_v30, 1.0  ;;  %vm375_vm4 = vcmp.gt.f32.partialorder %v1199_v41, 1.0  ;;  %s648_s28 = int_to_ptr.vmem [resolvable:$true] %s647_s28 }
  0x21   :  { %s706_s13 = sld [smem:[#allocation5 + $0x6]]  ;;  %v723_v53 = vadd.f32 -3.0, %v1210_v51  ;;  %s649_s2 = sshll.u32 %s1387_s7, 4  ;;  %vm434_vm5 = vcmp.gt.f32.partialorder %v1210_v51, 1.0  ;;  %s650_s2 = int_to_ptr.hbm [resolvable:$true] %s649_s2 }
  0x22   :  { %s205_s20 = scalar_select %p123_p0, 1, 0 }
  0x23   :  { %v201_v3 = vstv %s702_s4  ;;  %s710_s0 = sld [smem:[#allocation5 + $0xa]]  ;;  %s636_s15 = sshll.u32 %s1386_s6, 4  ;;  %s637_s15 = int_to_ptr.hbm [resolvable:$true] %s636_s15 }
  0x24   :  { %v199_v2 = vstv %s703_s11  ;;  %v206_v20 = vstv %s205_s20  ;;  %s711_s21 = sld [smem:[#allocation5 + $0xb]]  ;;  %s1085_s11 = smov [#allocation19]  }
  0x25   :  { %v1165_v5 = vstv %s704_s12  ;;  %v200_v6 = vmul.f32 %v713_v1, %v199_v2  ;;  %v746_v21 = vpop.eup %745  ;;  %vm1180_vm0 = vcmp.eq.s32.totalorder %v206_v20, 1  ;;  %s708_s3 = sld [smem:[#allocation5 + $0x8]]  ;;  %s672_s12 = sshll.u32 %s1085_s11, 4  ;;  %s673_s12 = int_to_ptr.vmem [resolvable:$true] %s672_s12 }
  0x26   :  { %s120_s16 = smul.f32 %s705_s5, %s702_s4  ;;  %v145_v8 = vmul.f32 %v713_v1, %v1165_v5  ;;  %s121_s19 = ssub.f32 1.0, %s705_s5  ;;  %v224_v26 = vmul.f32 %v717_v18, %v1165_v5  ;;  %v137_v28 = vmul.f32 %v746_v21, %v1167_v7  ;;  %v284_v38 = vmul.f32 %v719_v34, %v1165_v5 }
  0x27   :  { %v116_v9 = vstv %s706_s13  ;;  %v202_v10 = vadd.f32 %v201_v3, %v200_v6  ;;  %v343_v49 = vmul.f32 %v721_v45, %v1165_v5  ;;  %s707_s22 = sld [smem:[#allocation5 + $0x7]]  ;;  %v402_v59 = vmul.f32 %v723_v53, %v1165_v5  ;;  %v1227_v6 = vld [vmem:[#allocation10 + $0x28] sm:$0xff]  ;;  %s674_s4 = sshll.u32 %s1389_s9, 4  ;;  %s675_s4 = int_to_ptr.hbm [resolvable:$true] %s674_s4 }
  0x28   :  { %v117_v11 = vmul.f32 1.442695, %v116_v9  ;;  %v146_v12 = vadd.f32 %v145_v8, %v130_v4  ;;  %v1173_v14 = vstv %s121_s19  ;;  %v1175_v15 = vstv %s120_s16  ;;  %s712_s23 = sld [smem:[#allocation5 + $0xc]]  ;;  %s1086_s9 = smov [#allocation15]  }
  0x29   :  { %v203_v17 = vmax.f32 %v202_v10, 1.0  ;;  %v138_v32 = vsub.f32 2.0, %v137_v28  ;;  %v1219_v63 = vstv %s710_s0  ;;  %v725_v18 = vadd.f32 -3.0, %v1227_v6  ;;  %s701_s24 = sld [smem:[#allocation5 + $0x1]]  ;;  %s634_s5 = sshll.u32 %s1086_s9, 4  ;;  %s635_s5 = int_to_ptr.vmem [resolvable:$true] %s634_s5 }
  0x2a   :  { %747 = vpow2.f32 %v117_v11  ;;  %v148_v16 = vmul.f32 %v1173_v14, %v146_v12  ;;  %v1221_v1 = vstv %s711_s21  ;;  %s1248_s25 = sld [smem:[#allocation5]]  ;;  %vm493_vm6 = vcmp.gt.f32.partialorder %v1227_v6, 1.0  ;;  %s1087_s16 = smov [#allocation18]  }
  0x2b   :  { %v204_v23 = vmin.f32 %v203_v17, 10.0  ;;  %v139_v36 = vmul.f32 %v746_v21, %v138_v32  ;;  %v1223_v3 = vstv %s708_s3  ;;  %v1246_v32 = vld [vmem:[#allocation10 + $0x30] sm:$0xff]  ;;  %s709_s1 = sld [smem:[#allocation5 + $0x9]]  ;;  %s661_s19 = sshll.u32 %s1087_s16, 4  ;;  %s662_s19 = int_to_ptr.vmem [resolvable:$true] %s661_s19 }
  0x2c   :  { %v150_v19 = vadd.f32 %v1175_v15, %v148_v16  ;;  %vm552_vm7 = vcmp.gt.f32.partialorder %v1246_v32, 1.0  ;;  %s663_s21 = sshll.u32 %s1388_s8, 4  ;;  %s664_s21 = int_to_ptr.hbm [resolvable:$true] %s663_s21 }
  0x2d   :  { %v140_v42 = vmul.f32 %v139_v36, %v132_v39  ;;  %v1233_v11 = vstv %s707_s22  ;;  %v727_v36 = vadd.f32 -3.0, %v1246_v32 }
  0x2e   :  { %v151_v22 = vmax.f32 %v150_v19, 1.0  ;;  %v1236_v16 = vstv %s712_s23 }
  0x2f   :  { %v141_v46 = vmul.f32 1.442695, %v140_v42 }
  0x30   :  { %v748_v24 = vpop.eup %747  ;;  %v1185_v27 = vmin.f32 %v151_v22, 10.0 }
  0x31   :  { %732 = vpush %v748_v24 }
  0x32   :  { %v209_v29 = vsel %vm1180_vm0, %v204_v23, %v1185_v27  ;;  %749 = vlog2.f32 %v1185_v27  ;;  %v158_v42 = vsub.f32 11.0, %v1185_v27 }
  0x33   :  { %211 = vst [vmem:[#allocation16] sm:$0xff] %v209_v29  ;;  %v225_v31 = vadd.f32 %v224_v26, %v209_v29  ;;  %751 = vpow2.f32 %v141_v46  ;;  %v461_v26 = vmul.f32 %v725_v18, %v1165_v5  ;;  %v520_v46 = vmul.f32 %v727_v36, %v1165_v5 }
  0x34   :  { %753 = vlog2.f32 %v1167_v7 }
  0x35   :  { %v226_v33 = vmul.f32 %v225_v31, %v1173_v14 }
  0x37   :  { %v227_v35 = vadd.f32 %v226_v33, %v1175_v15 }
  0x38   :  { %v750_v54 = vpop.eup %749 }
  0x39   :  { %v228_v37 = vmax.f32 %v227_v35, 1.0  ;;  %v752_v56 = vpop.eup %751  ;;  %v156_v60 = vmul.f32 0.6931472, %v750_v54 }
  0x3a   :  { %v754_v57 = vpop.eup %753  ;;  %v157_v62 = vsub.f32 1.0, %v752_v56  ;;  %v1268_v56 = vld [vmem:[#allocation10 + $0x38] sm:$0xff] }
  0x3b   :  { %v1197_v40 = vmin.f32 %v228_v37, 10.0  ;;  %v154_v2 = vmul.f32 0.6931472, %v754_v57  ;;  %v175_v8 = vmul.f32 %v1219_v63, %v156_v60  ;;  %v716_v37 = vadd.f32 -1.0, %v1159_v0 }
  0x3c   :  { %v167_v12 = vmul.f32 %v1223_v3, %v157_v62  ;;  %v180_v21 = vmul.f32 %v1236_v16, %v157_v62  ;;  %v1272_v60 = vstv %s709_s1  ;;  %vm611_vm8 = vcmp.gt.f32.partialorder %v1268_v56, 1.0 }
  0x3d   :  { %263 = vst [vmem:[#allocation16 + $0x8] sm:$0xff] %v1197_v40  ;;  %v285_v43 = vadd.f32 %v284_v38, %v1197_v40  ;;  %v177_v9 = vmul.f32 %v1221_v1, %v154_v2  ;;  %v162_v19 = vmul.f32 %v1233_v11, %v154_v2  ;;  %v729_v2 = vadd.f32 -3.0, %v1268_v56 }
  0x3e   :  { %v168_v23 = vmul.f32 1.442695, %v167_v12 }
  0x3f   :  { %v286_v44 = vmul.f32 %v285_v43, %v1173_v14  ;;  %v178_v20 = vadd.f32 %v177_v9, %v175_v8  ;;  %v163_v28 = vmul.f32 1.442695, %v162_v19  ;;  %v193_v43 = vstv %s701_s24 }
  0x40   :  { %755 = vpow2.f32 %v168_v23  ;;  %v579_v19 = vmul.f32 %v729_v2, %v1165_v5 }
  0x41   :  { %v287_v47 = vadd.f32 %v286_v44, %v1175_v15  ;;  %v181_v29 = vadd.f32 %v180_v21, %v178_v20  ;;  %757 = vpow2.f32 %v163_v28 }
  0x43   :  { %v288_v48 = vmax.f32 %v287_v47, 1.0  ;;  %v182_v34 = vmul.f32 1.442695, %v181_v29 }
  0x45   :  { %v1208_v50 = vmin.f32 %v288_v48, 10.0  ;;  %759 = vpow2.f32 %v182_v34 }
  0x46   :  { %v756_v38 = vpop.eup %755  ;;  %761 = vlog2.f32 %v1197_v40 }
  0x47   :  { %323 = vst [vmem:[#allocation16 + $0x10] sm:$0xff] %v1208_v50  ;;  %v344_v52 = vadd.f32 %v343_v49, %v1208_v50  ;;  %v295_v44 = vsub.f32 11.0, %v1208_v50  ;;  %v758_v47 = vpop.eup %757  ;;  %v714_v49 = vadd.f32 -1.0, %v756_v38 }
  0x49   :  { %v345_v55 = vmul.f32 %v344_v52, %v1173_v14  ;;  %v194_v52 = vmul.f32 %v716_v37, %v193_v43 }
  0x4b   :  { %v346_v58 = vadd.f32 %v345_v55, %v1175_v15  ;;  %v195_v55 = vstv %s1248_s25 }
  0x4d   :  { %v347_v61 = vmax.f32 %v346_v58, 1.0 }
  0x4f   :  { %v1225_v4 = vmin.f32 %v347_v61, 10.0  ;;  %v196_v61 = vadd.f32 %v195_v55, %v194_v52  ;;  %v235_v52 = vsub.f32 11.0, %v1197_v40 }
  0x51   :  { %382 = vst [vmem:[#allocation16 + $0x18] sm:$0xff] %v1225_v4  ;;  %v403_v10 = vadd.f32 %v402_v59, %v1225_v4  ;;  %v760_v59 = vpop.eup %759 }
  0x52   :  { %v185_v12 = vmul.f32 %v760_v59, %v1272_v60 }
  0x53   :  { %v404_v17 = vmul.f32 %v403_v10, %v1173_v14 }
  0x55   :  { %v405_v22 = vadd.f32 %v404_v17, %v1175_v15  ;;  %v197_v17 = vmax.f32 %v196_v61, 0.1 }
  0x57   :  { %v406_v24 = vmax.f32 %v405_v22, 1.0 }
  0x59   :  { %v1244_v31 = vmin.f32 %v406_v24, 10.0  ;;  %v198_v24 = vmin.f32 %v197_v17, 36500.0 }
  0x5b   :  { %441 = vst [vmem:[#allocation16 + $0x20] sm:$0xff] %v1244_v31  ;;  %v462_v33 = vadd.f32 %v461_v26, %v1244_v31 }
  0x5d   :  { %v463_v35 = vmul.f32 %v462_v33, %v1173_v14 }
  0x5f   :  { %v464_v39 = vadd.f32 %v463_v35, %v1175_v15 }
  0x61   :  { %v465_v45 = vmax.f32 %v464_v39, 1.0  ;;  %v213_v39 = vld [vmem:[#allocation9 + $0x8] sm:$0xff] }
  0x62   :  { %s733_s26 = spop %732 }
  0x63   :  { %v1259_v48 = vstv %s733_s26  ;;  %v1261_v53 = vmin.f32 %v465_v45, 10.0 }
  0x64   :  { %v160_v54 = vmul.f32 %v1259_v48, %v158_v42  ;;  %v1266_v27 = vmul.f32 %v295_v44, %v1259_v48 }
  0x65   :  { %500 = vst [vmem:[#allocation16 + $0x28] sm:$0xff] %v1261_v53  ;;  %v521_v57 = vadd.f32 %v520_v46, %v1261_v53 }
  0x66   :  { %v165_v58 = vmul.f32 %v758_v47, %v160_v54  ;;  %v236_v54 = vmul.f32 %v235_v52, %v1259_v48 }
  0x67   :  { %v522_v62 = vmul.f32 %v521_v57, %v1173_v14 }
  0x68   :  { %v171_v8 = vmul.f32 %v714_v49, %v165_v58 }
  0x69   :  { %v523_v9 = vadd.f32 %v522_v62, %v1175_v15 }
  0x6a   :  { %v172_v10 = vadd.f32 1.0, %v171_v8 }
  0x6b   :  { %v524_v18 = vmax.f32 %v523_v9, 1.0 }
  0x6c   :  { %v173_v20 = vmul.f32 %v172_v10, %v1167_v7  ;;  %v762_v7 = vpop.eup %761 }
  0x6d   :  { %v1281_v21 = vmin.f32 %v524_v18, 10.0 }
  0x6e   :  { %v187_v22 = vsel %vm186_vm1, %v173_v20, %v185_v12 }
  0x6f   :  { %v188_v23 = vmax.f32 %v187_v22, 0.1  ;;  %559 = vst [vmem:[#allocation16 + $0x30] sm:$0xff] %v1281_v21  ;;  %v580_v26 = vadd.f32 %v579_v19, %v1281_v21 }
  0x71   :  { %v189_v28 = vmin.f32 %v188_v23, 36500.0  ;;  %v581_v0 = vmul.f32 %v580_v26, %v1173_v14  ;;  %v233_v14 = vmul.f32 0.6931472, %v762_v7 }
  0x73   :  { %v208_v29 = vsel %vm1180_vm0, %v198_v24, %v189_v28  ;;  %v582_v5 = vadd.f32 %v581_v0, %v1175_v15  ;;  %v248_v37 = vmul.f32 %v233_v14, %v1219_v63 }
  0x74   :  { %210 = vst [vmem:[#allocation15] sm:$0xff] %v208_v29  ;;  %763 = vrcp.f32 %v208_v29 }
  0x75   :  { %765 = vlog2.f32 %v208_v29  ;;  %v583_v33 = vmax.f32 %v582_v5, 1.0 }
  0x77   :  { %v1293_v34 = vmin.f32 %v583_v33, 10.0 }
  0x79   :  { %618 = vst [vmem:[#allocation16 + $0x38] sm:$0xff] %v1293_v34 }
  0x7a   :  { %v764_v25 = vpop.eup %763  ;;  %655 = dma.vmem_to_hbm [thread:$0]  %s648_s28, 1024, %s650_s2, [#allocation17], %s1078_s17, %s1078_s17, %s1079_s18   ;;  %629 = vst [vmem:[#allocation19] sm:$0xff] %v1293_v34 }
  0x7b   :  { %v766_v15 = vpop.eup %765  ;;  %v217_v35 = vmul.f32 %v764_v25, %v208_v29  ;;  %677 = dma.vmem_to_hbm [thread:$0]  %s673_s12, 128, %s675_s4, [#allocation20]  }
  0x7c   :  { %v231_v36 = vmul.f32 0.6931472, %v766_v15 }
  0x7d   :  { %v218_v38 = vsub.f32 2.0, %v217_v35 }
  0x7e   :  { %v237_v42 = vmul.f32 %v231_v36, %v1233_v11  ;;  %v249_v43 = vmul.f32 %v231_v36, %v1221_v1 }
  0x7f   :  { %v219_v44 = vmul.f32 %v764_v25, %v218_v38 }
  0x80   :  { %v238_v45 = vmul.f32 1.442695, %v237_v42  ;;  %v250_v46 = vadd.f32 %v249_v43, %v248_v37 }
  0x81   :  { %v220_v47 = vmul.f32 %v219_v44, %v213_v39 }
  0x82   :  { %767 = vpow2.f32 %v238_v45 }
  0x83   :  { %v221_v49 = vmul.f32 1.442695, %v220_v47 }
  0x85   :  { %769 = vpow2.f32 %v221_v49 }
  0x88   :  { %v768_v55 = vpop.eup %767 }
  0x89   :  { %v240_v57 = vmul.f32 %v768_v55, %v236_v54 }
  0x8b   :  { %v770_v58 = vpop.eup %769 }
  0x8c   :  { %v234_v59 = vsub.f32 1.0, %v770_v58 }
  0x8e   :  { %v241_v61 = vmul.f32 %v234_v59, %v1223_v3  ;;  %v251_v62 = vmul.f32 %v234_v59, %v1236_v16 }
  0x90   :  { %v242_v2 = vmul.f32 1.442695, %v241_v61  ;;  %v252_v8 = vadd.f32 %v251_v62, %v250_v46 }
  0x92   :  { %771 = vpow2.f32 %v242_v2  ;;  %v253_v9 = vmul.f32 1.442695, %v252_v8 }
  0x94   :  { %773 = vpow2.f32 %v253_v9 }
  0x95   :  { %775 = vlog2.f32 %v1208_v50 }
  0x98   :  { %v772_v10 = vpop.eup %771 }
  0x99   :  { %v718_v12 = vadd.f32 -1.0, %v772_v10 }
  0x9a   :  { %v774_v40 = vpop.eup %773 }
  0x9b   :  { %v245_v17 = vmul.f32 %v718_v12, %v240_v57  ;;  %v255_v20 = vmul.f32 %v774_v40, %v1272_v60  ;;  %v776_v26 = vpop.eup %775 }
  0x9c   :  { %v293_v28 = vmul.f32 0.6931472, %v776_v26  ;;  %v354_v26 = vsub.f32 11.0, %v1225_v4 }
  0x9d   :  { %v246_v18 = vadd.f32 1.0, %v245_v17 }
  0x9e   :  { %v308_v14 = vmul.f32 %v293_v28, %v1219_v63 }
  0x9f   :  { %v247_v19 = vmul.f32 %v246_v18, %v208_v29  ;;  %v273_v29 = vld [vmem:[#allocation9 + $0x10] sm:$0xff]  ;;  %v332_v18 = vld [vmem:[#allocation9 + $0x18] sm:$0xff] }
  0xa1   :  { %v257_v22 = vsel %vm256_vm2, %v247_v19, %v255_v20 }
  0xa2   :  { %v258_v23 = vmax.f32 %v257_v22, 0.1 }
  0xa4   :  { %v259_v24 = vmin.f32 %v258_v23, 36500.0 }
  0xa6   :  { %261 = vst [vmem:[#allocation15 + $0x8] sm:$0xff] %v259_v24  ;;  %777 = vrcp.f32 %v259_v24 }
  0xa7   :  { %779 = vlog2.f32 %v259_v24 }
  0xac   :  { %v778_v0 = vpop.eup %777 }
  0xad   :  { %v780_v5 = vpop.eup %779  ;;  %v277_v7 = vmul.f32 %v778_v0, %v259_v24 }
  0xae   :  { %v291_v33 = vmul.f32 0.6931472, %v780_v5 }
  0xaf   :  { %v278_v13 = vsub.f32 2.0, %v277_v7 }
  0xb0   :  { %v297_v25 = vmul.f32 %v291_v33, %v1233_v11  ;;  %v309_v15 = vmul.f32 %v291_v33, %v1221_v1 }
  0xb1   :  { %v279_v50 = vmul.f32 %v778_v0, %v278_v13  ;;  %v355_v0 = vmul.f32 %v354_v26, %v1259_v48 }
  0xb2   :  { %v298_v35 = vmul.f32 1.442695, %v297_v25  ;;  %v310_v36 = vadd.f32 %v309_v15, %v308_v14 }
  0xb3   :  { %v280_v37 = vmul.f32 %v279_v50, %v273_v29 }
  0xb4   :  { %781 = vpow2.f32 %v298_v35 }
  0xb5   :  { %v281_v38 = vmul.f32 1.442695, %v280_v37 }
  0xb7   :  { %783 = vpow2.f32 %v281_v38 }
  0xba   :  { %v782_v39 = vpop.eup %781 }
  0xbb   :  { %v300_v42 = vmul.f32 %v782_v39, %v1266_v27 }
  0xbd   :  { %v784_v43 = vpop.eup %783 }
  0xbe   :  { %v294_v44 = vsub.f32 1.0, %v784_v43 }
  0xc0   :  { %v301_v45 = vmul.f32 %v294_v44, %v1223_v3  ;;  %v311_v46 = vmul.f32 %v294_v44, %v1236_v16 }
  0xc2   :  { %v302_v47 = vmul.f32 1.442695, %v301_v45  ;;  %v312_v49 = vadd.f32 %v311_v46, %v310_v36 }
  0xc4   :  { %785 = vpow2.f32 %v302_v47  ;;  %v313_v52 = vmul.f32 1.442695, %v312_v49 }
  0xc6   :  { %787 = vpow2.f32 %v313_v52 }
  0xca   :  { %v786_v54 = vpop.eup %785 }
  0xcb   :  { %v720_v55 = vadd.f32 -1.0, %v786_v54 }
  0xcc   :  { %v788_v58 = vpop.eup %787 }
  0xcd   :  { %v305_v57 = vmul.f32 %v720_v55, %v300_v42  ;;  %v315_v27 = vmul.f32 %v788_v58, %v1272_v60 }
  0xcf   :  { %v306_v59 = vadd.f32 1.0, %v305_v57 }
  0xd1   :  { %v307_v61 = vmul.f32 %v306_v59, %v259_v24  ;;  %v391_v59 = vld [vmem:[#allocation9 + $0x20] sm:$0xff] }
  0xd3   :  { %v317_v62 = vsel %vm316_vm3, %v307_v61, %v315_v27 }
  0xd4   :  { %v318_v2 = vmax.f32 %v317_v62, 0.1 }
  0xd6   :  { %v319_v8 = vmin.f32 %v318_v2, 36500.0 }
  0xd8   :  { %321 = vst [vmem:[#allocation15 + $0x10] sm:$0xff] %v319_v8  ;;  %789 = vrcp.f32 %v319_v8 }
  0xd9   :  { %791 = vlog2.f32 %v319_v8 }
  0xda   :  { %793 = vlog2.f32 %v1225_v4 }
  0xde   :  { %v790_v9 = vpop.eup %789 }
  0xdf   :  { %v792_v10 = vpop.eup %791  ;;  %v336_v12 = vmul.f32 %v790_v9, %v319_v8 }
  0xe0   :  { %v350_v17 = vmul.f32 0.6931472, %v792_v10  ;;  %v794_v23 = vpop.eup %793 }
  0xe1   :  { %v337_v40 = vsub.f32 2.0, %v336_v12  ;;  %v352_v28 = vmul.f32 0.6931472, %v794_v23 }
  0xe2   :  { %v356_v19 = vmul.f32 %v350_v17, %v1233_v11  ;;  %v368_v14 = vmul.f32 %v350_v17, %v1221_v1 }
  0xe3   :  { %v338_v30 = vmul.f32 %v790_v9, %v337_v40  ;;  %v367_v33 = vmul.f32 %v352_v28, %v1219_v63  ;;  %v413_v9 = vsub.f32 11.0, %v1244_v31 }
  0xe4   :  { %v357_v20 = vmul.f32 1.442695, %v356_v19 }
  0xe5   :  { %v339_v22 = vmul.f32 %v338_v30, %v332_v18  ;;  %v369_v15 = vadd.f32 %v368_v14, %v367_v33  ;;  %v414_v12 = vmul.f32 %v413_v9, %v1259_v48 }
  0xe6   :  { %795 = vpow2.f32 %v357_v20 }
  0xe7   :  { %v340_v24 = vmul.f32 1.442695, %v339_v22 }
  0xe9   :  { %797 = vpow2.f32 %v340_v24 }
  0xec   :  { %v796_v5 = vpop.eup %795 }
  0xed   :  { %v359_v7 = vmul.f32 %v796_v5, %v355_v0 }
  0xef   :  { %v798_v13 = vpop.eup %797 }
  0xf0   :  { %v353_v29 = vsub.f32 1.0, %v798_v13 }
  0xf2   :  { %v360_v25 = vmul.f32 %v353_v29, %v1223_v3  ;;  %v370_v50 = vmul.f32 %v353_v29, %v1236_v16 }
  0xf4   :  { %v361_v35 = vmul.f32 1.442695, %v360_v25  ;;  %v371_v36 = vadd.f32 %v370_v50, %v369_v15 }
  0xf6   :  { %799 = vpow2.f32 %v361_v35  ;;  %v372_v4 = vmul.f32 1.442695, %v371_v36 }
  0xf8   :  { %801 = vpow2.f32 %v372_v4 }
  0xfc   :  { %v800_v37 = vpop.eup %799 }
  0xfd   :  { %v722_v38 = vadd.f32 -1.0, %v800_v37 }
  0xfe   :  { %v802_v42 = vpop.eup %801 }
  0xff   :  { %v364_v39 = vmul.f32 %v722_v38, %v359_v7  ;;  %v374_v45 = vmul.f32 %v802_v42, %v1272_v60 }
 0x101   :  { %v365_v43 = vadd.f32 1.0, %v364_v39  ;;  %v450_v39 = vld [vmem:[#allocation9 + $0x28] sm:$0xff] }
 0x103   :  { %v366_v44 = vmul.f32 %v365_v43, %v319_v8 }
 0x105   :  { %v376_v46 = vsel %vm375_vm4, %v366_v44, %v374_v45 }
 0x106   :  { %v377_v47 = vmax.f32 %v376_v46, 0.1 }
 0x108   :  { %v378_v49 = vmin.f32 %v377_v47, 36500.0  ;;  %v472_v47 = vsub.f32 11.0, %v1261_v53 }
 0x10a   :  { %380 = vst [vmem:[#allocation15 + $0x18] sm:$0xff] %v378_v49  ;;  %803 = vrcp.f32 %v378_v49 }
 0x10b   :  { %805 = vlog2.f32 %v378_v49 }
 0x10c   :  { %807 = vlog2.f32 %v1244_v31 }
 0x110   :  { %v804_v52 = vpop.eup %803 }
 0x111   :  { %v806_v54 = vpop.eup %805  ;;  %v395_v55 = vmul.f32 %v804_v52, %v378_v49 }
 0x112   :  { %v409_v57 = vmul.f32 0.6931472, %v806_v54  ;;  %v808_v2 = vpop.eup %807 }
 0x113   :  { %v396_v58 = vsub.f32 2.0, %v395_v55  ;;  %v411_v10 = vmul.f32 0.6931472, %v808_v2 }
 0x114   :  { %v415_v61 = vmul.f32 %v409_v57, %v1233_v11  ;;  %v427_v19 = vmul.f32 %v409_v57, %v1221_v1 }
 0x115   :  { %v397_v41 = vmul.f32 %v804_v52, %v396_v58  ;;  %v426_v18 = vmul.f32 %v411_v10, %v1219_v63  ;;  %v473_v52 = vmul.f32 %v472_v47, %v1259_v48 }
 0x116   :  { %v416_v27 = vmul.f32 1.442695, %v415_v61 }
 0x117   :  { %v398_v62 = vmul.f32 %v397_v41, %v391_v59  ;;  %v428_v23 = vadd.f32 %v427_v19, %v426_v18 }
 0x118   :  { %809 = vpow2.f32 %v416_v27 }
 0x119   :  { %v399_v8 = vmul.f32 1.442695, %v398_v62 }
 0x11b   :  { %811 = vpow2.f32 %v399_v8 }
 0x11e   :  { %v810_v17 = vpop.eup %809 }
 0x11f   :  { %v418_v40 = vmul.f32 %v810_v17, %v414_v12 }
 0x121   :  { %v812_v30 = vpop.eup %811 }
 0x122   :  { %v412_v20 = vsub.f32 1.0, %v812_v30 }
 0x124   :  { %v419_v22 = vmul.f32 %v412_v20, %v1223_v3  ;;  %v429_v24 = vmul.f32 %v412_v20, %v1236_v16 }
 0x126   :  { %v420_v26 = vmul.f32 1.442695, %v419_v22  ;;  %v430_v28 = vadd.f32 %v429_v24, %v428_v23 }
 0x128   :  { %813 = vpow2.f32 %v420_v26  ;;  %v431_v31 = vmul.f32 1.442695, %v430_v28 }
 0x12a   :  { %815 = vpow2.f32 %v431_v31 }
 0x12e   :  { %v814_v0 = vpop.eup %813 }
 0x12f   :  { %v724_v5 = vadd.f32 -1.0, %v814_v0  ;;  %v509_v0 = vld [vmem:[#allocation9 + $0x30] sm:$0xff] }
 0x130   :  { %v816_v33 = vpop.eup %815 }
 0x131   :  { %v423_v7 = vmul.f32 %v724_v5, %v418_v40  ;;  %v433_v29 = vmul.f32 %v816_v33, %v1272_v60 }
 0x133   :  { %v424_v14 = vadd.f32 1.0, %v423_v7 }
 0x135   :  { %v425_v13 = vmul.f32 %v424_v14, %v378_v49 }
 0x137   :  { %v435_v25 = vsel %vm434_vm5, %v425_v13, %v433_v29  ;;  %v531_v29 = vsub.f32 11.0, %v1281_v21 }
 0x138   :  { %v436_v15 = vmax.f32 %v435_v25, 0.1 }
 0x13a   :  { %v437_v50 = vmin.f32 %v436_v15, 36500.0  ;;  %v532_v15 = vmul.f32 %v531_v29, %v1259_v48 }
 0x13c   :  { %439 = vst [vmem:[#allocation15 + $0x20] sm:$0xff] %v437_v50  ;;  %817 = vrcp.f32 %v437_v50 }
 0x13d   :  { %819 = vlog2.f32 %v437_v50 }
 0x13e   :  { %821 = vlog2.f32 %v1261_v53 }
 0x142   :  { %v818_v35 = vpop.eup %817 }
 0x143   :  { %v820_v36 = vpop.eup %819  ;;  %v454_v4 = vmul.f32 %v818_v35, %v437_v50 }
 0x144   :  { %v468_v37 = vmul.f32 0.6931472, %v820_v36  ;;  %v822_v45 = vpop.eup %821 }
 0x145   :  { %v455_v38 = vsub.f32 2.0, %v454_v4  ;;  %v470_v49 = vmul.f32 0.6931472, %v822_v45 }
 0x146   :  { %v474_v42 = vmul.f32 %v468_v37, %v1233_v11  ;;  %v486_v58 = vmul.f32 %v468_v37, %v1221_v1 }
 0x147   :  { %v456_v51 = vmul.f32 %v818_v35, %v455_v38  ;;  %v485_v57 = vmul.f32 %v470_v49, %v1219_v63 }
 0x148   :  { %v475_v43 = vmul.f32 1.442695, %v474_v42 }
 0x149   :  { %v457_v44 = vmul.f32 %v456_v51, %v450_v39  ;;  %v487_v27 = vadd.f32 %v486_v58, %v485_v57 }
 0x14a   :  { %823 = vpow2.f32 %v475_v43 }
 0x14b   :  { %v458_v46 = vmul.f32 1.442695, %v457_v44 }
 0x14d   :  { %825 = vpow2.f32 %v458_v46 }
 0x150   :  { %v824_v54 = vpop.eup %823 }
 0x151   :  { %v477_v55 = vmul.f32 %v824_v54, %v473_v52 }
 0x153   :  { %v826_v59 = vpop.eup %825 }
 0x154   :  { %v471_v61 = vsub.f32 1.0, %v826_v59 }
 0x156   :  { %v478_v41 = vmul.f32 %v471_v61, %v1223_v3  ;;  %v488_v62 = vmul.f32 %v471_v61, %v1236_v16 }
 0x158   :  { %v479_v53 = vmul.f32 1.442695, %v478_v41  ;;  %v489_v2 = vadd.f32 %v488_v62, %v487_v27 }
 0x15a   :  { %827 = vpow2.f32 %v479_v53  ;;  %v490_v8 = vmul.f32 1.442695, %v489_v2  ;;  %v568_v2 = vld [vmem:[#allocation9 + $0x38] sm:$0xff] }
 0x15c   :  { %829 = vpow2.f32 %v490_v8 }
 0x160   :  { %v828_v9 = vpop.eup %827 }
 0x161   :  { %v726_v10 = vadd.f32 -1.0, %v828_v9 }
 0x162   :  { %v830_v17 = vpop.eup %829 }
 0x163   :  { %v482_v12 = vmul.f32 %v726_v10, %v477_v55  ;;  %v492_v19 = vmul.f32 %v830_v17, %v1272_v60 }
 0x165   :  { %v483_v40 = vadd.f32 1.0, %v482_v12 }
 0x167   :  { %v484_v18 = vmul.f32 %v483_v40, %v437_v50  ;;  %v590_v40 = vsub.f32 11.0, %v1293_v34 }
 0x169   :  { %v494_v30 = vsel %vm493_vm6, %v484_v18, %v492_v19  ;;  %v591_v19 = vmul.f32 %v590_v40, %v1259_v48 }
 0x16a   :  { %v495_v20 = vmax.f32 %v494_v30, 0.1 }
 0x16c   :  { %v496_v22 = vmin.f32 %v495_v20, 36500.0 }
 0x16e   :  { %498 = vst [vmem:[#allocation15 + $0x28] sm:$0xff] %v496_v22  ;;  %831 = vrcp.f32 %v496_v22 }
 0x16f   :  { %833 = vlog2.f32 %v496_v22 }
 0x170   :  { %835 = vlog2.f32 %v1281_v21 }
 0x174   :  { %v832_v23 = vpop.eup %831 }
 0x175   :  { %v834_v24 = vpop.eup %833  ;;  %v513_v26 = vmul.f32 %v832_v23, %v496_v22 }
 0x176   :  { %v527_v28 = vmul.f32 0.6931472, %v834_v24  ;;  %v836_v14 = vpop.eup %835 }
 0x177   :  { %v514_v31 = vsub.f32 2.0, %v513_v26  ;;  %v529_v25 = vmul.f32 0.6931472, %v836_v14 }
 0x178   :  { %v533_v5 = vmul.f32 %v527_v28, %v1233_v11  ;;  %v545_v4 = vmul.f32 %v527_v28, %v1221_v1 }
 0x179   :  { %v515_v6 = vmul.f32 %v832_v23, %v514_v31  ;;  %v544_v36 = vmul.f32 %v529_v25, %v1219_v63 }
 0x17a   :  { %v534_v7 = vmul.f32 1.442695, %v533_v5 }
 0x17b   :  { %v516_v33 = vmul.f32 %v515_v6, %v509_v0  ;;  %v546_v42 = vadd.f32 %v545_v4, %v544_v36 }
 0x17c   :  { %837 = vpow2.f32 %v534_v7 }
 0x17d   :  { %v517_v13 = vmul.f32 1.442695, %v516_v33 }
 0x17f   :  { %839 = vpow2.f32 %v517_v13 }
 0x182   :  { %v838_v50 = vpop.eup %837 }
 0x183   :  { %v536_v35 = vmul.f32 %v838_v50, %v532_v15 }
 0x185   :  { %v840_v37 = vpop.eup %839 }
 0x186   :  { %v530_v38 = vsub.f32 1.0, %v840_v37 }
 0x188   :  { %v537_v39 = vmul.f32 %v530_v38, %v1223_v3  ;;  %v547_v51 = vmul.f32 %v530_v38, %v1236_v16 }
 0x18a   :  { %v538_v43 = vmul.f32 1.442695, %v537_v39  ;;  %v548_v44 = vadd.f32 %v547_v51, %v546_v42 }
 0x18c   :  { %841 = vpow2.f32 %v538_v43  ;;  %v549_v21 = vmul.f32 1.442695, %v548_v44 }
 0x18e   :  { %843 = vpow2.f32 %v549_v21 }
 0x192   :  { %v842_v45 = vpop.eup %841 }
 0x193   :  { %v728_v46 = vadd.f32 -1.0, %v842_v45 }
 0x194   :  { %v844_v49 = vpop.eup %843 }
 0x195   :  { %v541_v47 = vmul.f32 %v728_v46, %v536_v35  ;;  %v551_v55 = vmul.f32 %v844_v49, %v1272_v60 }
 0x197   :  { %v542_v52 = vadd.f32 1.0, %v541_v47 }
 0x199   :  { %v543_v54 = vmul.f32 %v542_v52, %v496_v22 }
 0x19b   :  { %v553_v57 = vsel %vm552_vm7, %v543_v54, %v551_v55 }
 0x19c   :  { %v554_v58 = vmax.f32 %v553_v57, 0.1 }
 0x19e   :  { %v555_v59 = vmin.f32 %v554_v58, 36500.0 }
 0x1a0   :  { %557 = vst [vmem:[#allocation15 + $0x30] sm:$0xff] %v555_v59  ;;  %845 = vrcp.f32 %v555_v59 }
 0x1a1   :  { %847 = vlog2.f32 %v555_v59 }
 0x1a2   :  { %849 = vlog2.f32 %v1293_v34 }
 0x1a6   :  { %v846_v61 = vpop.eup %845 }
 0x1a7   :  { %v848_v41 = vpop.eup %847  ;;  %v572_v27 = vmul.f32 %v846_v61, %v555_v59 }
 0x1a8   :  { %v586_v62 = vmul.f32 0.6931472, %v848_v41  ;;  %v850_v12 = vpop.eup %849 }
 0x1a9   :  { %v573_v53 = vsub.f32 2.0, %v572_v27  ;;  %v588_v18 = vmul.f32 0.6931472, %v850_v12 }
 0x1aa   :  { %v592_v8 = vmul.f32 %v586_v62, %v1233_v11  ;;  %v604_v23 = vmul.f32 %v586_v62, %v1221_v1 }
 0x1ab   :  { %v574_v32 = vmul.f32 %v846_v61, %v573_v53  ;;  %v603_v22 = vmul.f32 %v588_v18, %v1219_v63 }
 0x1ac   :  { %v593_v9 = vmul.f32 1.442695, %v592_v8 }
 0x1ad   :  { %v575_v10 = vmul.f32 %v574_v32, %v568_v2  ;;  %v605_v28 = vadd.f32 %v604_v23, %v603_v22 }
 0x1ae   :  { %851 = vpow2.f32 %v593_v9 }
 0x1af   :  { %v576_v17 = vmul.f32 1.442695, %v575_v10 }
 0x1b1   :  { %853 = vpow2.f32 %v576_v17 }
 0x1b4   :  { %v852_v30 = vpop.eup %851 }
 0x1b5   :  { %v595_v20 = vmul.f32 %v852_v30, %v591_v19 }
 0x1b7   :  { %v854_v24 = vpop.eup %853 }
 0x1b8   :  { %v589_v11 = vsub.f32 1.0, %v854_v24 }
 0x1ba   :  { %v596_v26 = vmul.f32 %v589_v11, %v1223_v3  ;;  %v606_v31 = vmul.f32 %v589_v11, %v1236_v16 }
 0x1bc   :  { %v597_v0 = vmul.f32 1.442695, %v596_v26  ;;  %v607_v5 = vadd.f32 %v606_v31, %v605_v28 }
 0x1be   :  { %855 = vpow2.f32 %v597_v0  ;;  %v608_v34 = vmul.f32 1.442695, %v607_v5 }
 0x1c0   :  { %857 = vpow2.f32 %v608_v34 }
 0x1c4   :  { %v856_v6 = vpop.eup %855 }
 0x1c5   :  { %v730_v48 = vadd.f32 -1.0, %v856_v6 }
 0x1c6   :  { %v858_v33 = vpop.eup %857 }
 0x1c7   :  { %v600_v7 = vmul.f32 %v730_v48, %v595_v20  ;;  %v610_v1 = vmul.f32 %v858_v33, %v1272_v60 }
 0x1c9   :  { %v601_v14 = vadd.f32 1.0, %v600_v7 }
 0x1cb   :  { %v602_v63 = vmul.f32 %v601_v14, %v555_v59 }
 0x1cd   :  { %v612_v13 = vsel %vm611_vm8, %v602_v63, %v610_v1 }
 0x1ce   :  { %v613_v3 = vmax.f32 %v612_v13, 0.1 }
 0x1d0   :  { %v614_v16 = vmin.f32 %v613_v3, 36500.0 }
 0x1d2   :  { %616 = vst [vmem:[#allocation15 + $0x38] sm:$0xff] %v614_v16 }
 0x1d3   :  { %628 = vst [vmem:[#allocation18] sm:$0xff] %v614_v16  ;;  %642 = dma.vmem_to_hbm [thread:$0]  %s635_s5, 1024, %s637_s15, [#allocation7], %s1078_s17, %s1078_s17, %s1079_s18  }
 0x1d4   :  { %666 = dma.vmem_to_hbm [thread:$0]  %s662_s19, 128, %s664_s21, [#allocation17]  }
 0x1d5   :  { %1071 = dma.done.wait [#allocation7], 1024  }
 0x1d6   :  { %1072 = vsyncadd [#allocation7], 4294966272 }
 0x1d7   :  { %1073 = dma.done.wait [#allocation17], 1152  }
 0x1d8   :  { %1074 = vsyncadd [#allocation17], 4294966144 }
 0x1d9   :  { %1075 = dma.done.wait [#allocation20], 128  }
 0x1da   :  { %1076 = vsyncadd [#allocation20], 4294967168 }
 0x1db   :  { %694 = vsyncpa [#allocation6], 1 }
 0x1dc   :  { %695 = vsyncpa [#allocation11], 1 }
 0x1dd   :  { %696 = vsyncpa [#allocation14], 1 }
 0x1de   :  { %697 = vsyncpa [#allocation7], 1 }
 0x1df   :  { %698 = vsyncpa [#allocation17], 1 }
 0x1e0   :  { %699 = vsyncpa [#allocation20], 1 }
 0x1e1   :  { %700 = vsyncpa [#allocation8], 1 }

</bundles_post_ra>
